<compile_context>
chip_gen: v6e
topology: v6e:2x2x1
jax: 0.10.0
libtpu: 0.0.40
codegen_flags: <defaults>
</compile_context>

<pallas_src>
import jax
import jax.numpy as jnp
from jax import lax
from jax.experimental import pallas as pl
from jax.experimental.pallas import tpu as pltpu

# ---- tiny-BERT config (small shapes consistent with the forward pass) -------
B, S = 2, 8            # batch, sequence length
H, NH = 64, 2          # hidden size, attention heads
HD = H // NH           # head dim
I = 128                # FFN intermediate size
C = 3                  # num_classes
VOCAB = 32             # word vocab
TYPE_VOCAB = 2         # token-type vocab
NLAYER = 2             # encoder layers
LN_EPS = 1e-12
BS = B * S


def _layernorm(x, g, b):
    mu = jnp.mean(x, axis=-1, keepdims=True)
    var = jnp.mean((x - mu) ** 2, axis=-1, keepdims=True)
    return (x - mu) * lax.rsqrt(var + LN_EPS) * g + b


# ----------------------------- fully fused kernel ----------------------------
def bert_fused_kernel(ids_ref, seg_ref, mask_ref,
                      wemb_ref, temb_ref, pemb_ref, eg_ref, eb_ref,
                      wqkv_ref, bqkv_ref, wo_ref, bo_ref,
                      ln1g_ref, ln1b_ref, w1_ref, b1_ref,
                      w2_ref, b2_ref, ln2g_ref, ln2b_ref,
                      wp_ref, bp_ref, wc_ref, bc_ref,
                      out_ref):
    f32 = jnp.float32
    bf16 = jnp.bfloat16

    # ---- embeddings: gather-free one-hot matmuls + embedding LayerNorm ------
    ids = ids_ref[...]                                        # (B*S, 1) int32
    seg = seg_ref[...]                                        # (B*S, 1) int32
    word_oh = (lax.broadcasted_iota(jnp.int32, (BS, VOCAB), 1) == ids).astype(f32)
    tok_oh = (lax.broadcasted_iota(jnp.int32, (BS, TYPE_VOCAB), 1) == seg).astype(f32)
    we = jnp.dot(word_oh, wemb_ref[...], preferred_element_type=f32)
    te = jnp.dot(tok_oh, temb_ref[...], preferred_element_type=f32)
    pe = jnp.concatenate([pemb_ref[...]] * B, axis=0)         # (B*S, H)
    x = _layernorm(we + te + pe, eg_ref[...], eb_ref[...])    # (B*S, H) f32

    # additive attention bias: 0 where attended, -10000 where masked. (B, S)
    bias = (1.0 - mask_ref[...].astype(f32)) * -10000.0

    scale = 1.0 / (HD ** 0.5)
    for l in range(NLAYER):                                   # static unroll
        # fused QKV projection for the whole flattened batch (one MXU push)
        qkv = jnp.dot(x.astype(bf16), wqkv_ref[l],
                      preferred_element_type=f32) + bqkv_ref[l]   # (B*S, 3H)
        wo_l = wo_ref[l]                                      # (H, H) bf16

        ctx_rows = []
        for b in range(B):                                    # static, B=2
            qkv_b = qkv[b * S:(b + 1) * S]                    # (S, 3H) sublane slice
            bias_b = bias[b:b + 1, :]                         # (1, S)
            ctx_o = jnp.zeros((S, H), f32)
            for h in range(NH):                               # static, NH=2
                q = qkv_b[:, h * HD:(h + 1) * HD]
                k = qkv_b[:, H + h * HD:H + (h + 1) * HD]
                v = qkv_b[:, 2 * H + h * HD:2 * H + (h + 1) * HD]
                s = jnp.dot(q, k.T, preferred_element_type=f32) * scale + bias_b
                s = s - jnp.max(s, axis=-1, keepdims=True)
                p = jnp.exp(s)
                p = p * pl.reciprocal(jnp.sum(p, axis=-1, keepdims=True),
                                      approx=True)
                ctx = jnp.dot(p, v, preferred_element_type=f32)      # (S, HD)
                # fold per-head output projection in -> no lane-axis concat
                ctx_o = ctx_o + jnp.dot(ctx.astype(bf16),
                                        wo_l[h * HD:(h + 1) * HD, :],
                                        preferred_element_type=f32)
            ctx_rows.append(ctx_o)
        attn = jnp.concatenate(ctx_rows, axis=0) + bo_ref[l]  # (B*S, H)

        x = _layernorm(x + attn, ln1g_ref[l], ln1b_ref[l])

        # TODO(synk): BERT uses exact erf-GELU; tanh-approx GELU used here (EUP path).
        hmid = jax.nn.gelu(jnp.dot(x.astype(bf16), w1_ref[l],
                                   preferred_element_type=f32) + b1_ref[l],
                           approximate=True)
        ffn = jnp.dot(hmid.astype(bf16), w2_ref[l],
                      preferred_element_type=f32) + b2_ref[l]
        x = _layernorm(x + ffn, ln2g_ref[l], ln2b_ref[l])

    # ---- pooler (tanh on CLS token of each batch row) + classifier ----------
    cls = jnp.concatenate([x[b * S:b * S + 1, :] for b in range(B)], axis=0)  # (B, H)
    pooled = jnp.tanh(jnp.dot(cls.astype(bf16), wp_ref[...],
                              preferred_element_type=f32) + bp_ref[...])
    out_ref[...] = jnp.dot(pooled.astype(bf16), wc_ref[...],
                           preferred_element_type=f32) + bc_ref[...]


# ----------------------------- parameter creation ----------------------------
def make_params(key):
    def nrm(k, shape, scale=0.02, dtype=jnp.float32):
        return (scale * jax.random.normal(k, shape, dtype=jnp.float32)).astype(dtype)

    ks = iter(jax.random.split(key, 16))
    bf16, f32 = jnp.bfloat16, jnp.float32
    return {
        'word_emb': nrm(next(ks), (VOCAB, H)),
        'pos_emb':  nrm(next(ks), (S, H)),
        'tok_emb':  nrm(next(ks), (TYPE_VOCAB, H)),
        'emb_ln_g': jnp.ones((1, H), f32),
        'emb_ln_b': jnp.zeros((1, H), f32),
        # per-layer weights stacked along a leading NLAYER axis;
        # matmul weights stored in bf16 (f32 accumulation in-kernel).
        'wqkv': nrm(next(ks), (NLAYER, H, 3 * H), dtype=bf16),   # fused [Wq|Wk|Wv]
        'bqkv': jnp.zeros((NLAYER, 1, 3 * H), f32),
        'wo':   nrm(next(ks), (NLAYER, H, H), dtype=bf16),
        'bo':   jnp.zeros((NLAYER, 1, H), f32),
        'ln1g': jnp.ones((NLAYER, 1, H), f32),
        'ln1b': jnp.zeros((NLAYER, 1, H), f32),
        'w1':   nrm(next(ks), (NLAYER, H, I), dtype=bf16),
        'b1':   jnp.zeros((NLAYER, 1, I), f32),
        'w2':   nrm(next(ks), (NLAYER, I, H), dtype=bf16),
        'b2':   jnp.zeros((NLAYER, 1, H), f32),
        'ln2g': jnp.ones((NLAYER, 1, H), f32),
        'ln2b': jnp.zeros((NLAYER, 1, H), f32),
        'pool_w': nrm(next(ks), (H, H), dtype=bf16),
        'pool_b': jnp.zeros((1, H), f32),
        'cls_w':  nrm(next(ks), (H, C), dtype=bf16),
        'cls_b':  jnp.zeros((1, C), f32),
    }


# --------------------------------- forward -----------------------------------
def bertmodel_forward(text, params):
    # text: (B, 3, S) int32, channels = [input_ids, attention_mask, token_type_ids]
    ids2d = text[:, 0, :].astype(jnp.int32).reshape(BS, 1)
    input_mask = text[:, 1, :].astype(jnp.int32)              # (B, S)
    seg2d = text[:, 2, :].astype(jnp.int32).reshape(BS, 1)

    args = (ids2d, seg2d, input_mask,
            params['word_emb'], params['tok_emb'], params['pos_emb'],
            params['emb_ln_g'], params['emb_ln_b'],
            params['wqkv'], params['bqkv'], params['wo'], params['bo'],
            params['ln1g'], params['ln1b'], params['w1'], params['b1'],
            params['w2'], params['b2'], params['ln2g'], params['ln2b'],
            params['pool_w'], params['pool_b'], params['cls_w'], params['cls_b'])

    vmem = pltpu.MemorySpace.VMEM
    return pl.pallas_call(
        bert_fused_kernel,
        out_shape=jax.ShapeDtypeStruct((B, C), jnp.float32),
        in_specs=[pl.BlockSpec(memory_space=vmem) for _ in args],
        out_specs=pl.BlockSpec(memory_space=vmem),
    )(*args)


if __name__ == "__main__":
    key = jax.random.PRNGKey(0)
    k_ids, k_params = jax.random.split(key)

    input_ids = jax.random.randint(k_ids, (B, S), 0, VOCAB, dtype=jnp.int32)
    attention_mask = jnp.array(
        [[1] * S, [1] * (S - 3) + [0] * 3], dtype=jnp.int32)
    token_type_ids = jnp.concatenate(
        [jnp.zeros((B, S // 2), jnp.int32), jnp.ones((B, S // 2), jnp.int32)],
        axis=1)
    text = jnp.stack([input_ids, attention_mask, token_type_ids], axis=1)  # (B,3,S)

    params = make_params(k_params)

    logits = jax.jit(bertmodel_forward)(text, params)
    jax.block_until_ready(logits)
    assert logits.shape == (B, C) and logits.dtype == jnp.float32
    print("KERNEL_OK")
</pallas_src>

<mosaic_0001>
module attributes {stable_mosaic.version = 11 : i64} {
  func.func @bert_fused_kernel(%arg0: memref<16x1xi32, #tpu.memory_space<vmem>>, %arg1: memref<16x1xi32, #tpu.memory_space<vmem>>, %arg2: memref<2x8xi32, #tpu.memory_space<vmem>>, %arg3: memref<32x64xf32, #tpu.memory_space<vmem>>, %arg4: memref<2x64xf32, #tpu.memory_space<vmem>>, %arg5: memref<8x64xf32, #tpu.memory_space<vmem>>, %arg6: memref<1x64xf32, #tpu.memory_space<vmem>>, %arg7: memref<1x64xf32, #tpu.memory_space<vmem>>, %arg8: memref<2x64x192xbf16, #tpu.memory_space<vmem>>, %arg9: memref<2x1x192xf32, #tpu.memory_space<vmem>>, %arg10: memref<2x64x64xbf16, #tpu.memory_space<vmem>>, %arg11: memref<2x1x64xf32, #tpu.memory_space<vmem>>, %arg12: memref<2x1x64xf32, #tpu.memory_space<vmem>>, %arg13: memref<2x1x64xf32, #tpu.memory_space<vmem>>, %arg14: memref<2x64x128xbf16, #tpu.memory_space<vmem>>, %arg15: memref<2x1x128xf32, #tpu.memory_space<vmem>>, %arg16: memref<2x128x64xbf16, #tpu.memory_space<vmem>>, %arg17: memref<2x1x64xf32, #tpu.memory_space<vmem>>, %arg18: memref<2x1x64xf32, #tpu.memory_space<vmem>>, %arg19: memref<2x1x64xf32, #tpu.memory_space<vmem>>, %arg20: memref<64x64xbf16, #tpu.memory_space<vmem>>, %arg21: memref<1x64xf32, #tpu.memory_space<vmem>>, %arg22: memref<64x3xbf16, #tpu.memory_space<vmem>>, %arg23: memref<1x3xf32, #tpu.memory_space<vmem>>, %arg24: memref<2x3xf32, #tpu.memory_space<vmem>>) attributes {dimension_semantics = [], scalar_prefetch = 0 : i64, scratch_operands = 0 : i64, tpu.core_type = #tpu.core_type<tc>} {
    %c0 = arith.constant 0 : index
    %c0_0 = arith.constant 0 : index
    %0 = vector.load %arg0[%c0, %c0_0] : memref<16x1xi32, #tpu.memory_space<vmem>>, vector<16x1xi32>
    %c0_1 = arith.constant 0 : index
    %c0_2 = arith.constant 0 : index
    %1 = vector.load %arg1[%c0_1, %c0_2] : memref<16x1xi32, #tpu.memory_space<vmem>>, vector<16x1xi32>
    %2 = tpu.iota {dimensions = array<i32: 1>} : vector<16x32xi32>
    %3 = vector.broadcast %0 : vector<16x1xi32> to vector<16x32xi32>
    %4 = arith.cmpi eq, %2, %3 : vector<16x32xi32>
    %5 = arith.extui %4 : vector<16x32xi1> to vector<16x32xi32>
    %6 = arith.sitofp %5 : vector<16x32xi32> to vector<16x32xf32>
    %7 = tpu.iota {dimensions = array<i32: 1>} : vector<16x2xi32>
    %8 = vector.broadcast %1 : vector<16x1xi32> to vector<16x2xi32>
    %9 = arith.cmpi eq, %7, %8 : vector<16x2xi32>
    %10 = arith.extui %9 : vector<16x2xi1> to vector<16x2xi32>
    %11 = arith.sitofp %10 : vector<16x2xi32> to vector<16x2xf32>
    %c0_3 = arith.constant 0 : index
    %c0_4 = arith.constant 0 : index
    %12 = vector.load %arg3[%c0_3, %c0_4] : memref<32x64xf32, #tpu.memory_space<vmem>>, vector<32x64xf32>
    %cst = arith.constant dense<0.000000e+00> : vector<16x64xf32>
    %13 = tpu.matmul %6, %12, %cst {dimension_numbers = #tpu.dot_dimension_numbers<[1], [0], [0], [1], [0, 0, 1, 1], [], []>} : vector<16x32xf32>, vector<32x64xf32>, vector<16x64xf32> -> vector<16x64xf32>
    %c0_5 = arith.constant 0 : index
    %c0_6 = arith.constant 0 : index
    %14 = vector.load %arg4[%c0_5, %c0_6] : memref<2x64xf32, #tpu.memory_space<vmem>>, vector<2x64xf32>
    %cst_7 = arith.constant dense<0.000000e+00> : vector<16x64xf32>
    %15 = tpu.matmul %11, %14, %cst_7 {dimension_numbers = #tpu.dot_dimension_numbers<[1], [0], [0], [1], [0, 0, 1, 1], [], []>} : vector<16x2xf32>, vector<2x64xf32>, vector<16x64xf32> -> vector<16x64xf32>
    %c0_8 = arith.constant 0 : index
    %c0_9 = arith.constant 0 : index
    %16 = vector.load %arg5[%c0_8, %c0_9] : memref<8x64xf32, #tpu.memory_space<vmem>>, vector<8x64xf32>
    %17 = tpu.concatenate %16, %16 in 0 : vector<8x64xf32>, vector<8x64xf32> -> vector<16x64xf32>
    %18 = arith.addf %13, %15 : vector<16x64xf32>
    %19 = arith.addf %18, %17 : vector<16x64xf32>
    %c0_10 = arith.constant 0 : index
    %c0_11 = arith.constant 0 : index
    %20 = vector.load %arg6[%c0_10, %c0_11] : memref<1x64xf32, #tpu.memory_space<vmem>>, vector<1x64xf32>
    %c0_12 = arith.constant 0 : index
    %c0_13 = arith.constant 0 : index
    %21 = vector.load %arg7[%c0_12, %c0_13] : memref<1x64xf32, #tpu.memory_space<vmem>>, vector<1x64xf32>
    %cst_14 = arith.constant dense<0.000000e+00> : vector<16xf32>
    %22 = vector.multi_reduction <add>, %19, %cst_14 [1] : vector<16x64xf32> to vector<16xf32>
    %23 = vector.shape_cast %22 : vector<16xf32> to vector<16x1xf32>
    %cst_15 = arith.constant 6.400000e+01 : f32
    %24 = vector.broadcast %cst_15 : f32 to vector<16x1xf32>
    %25 = arith.divf %23, %24 : vector<16x1xf32>
    %26 = vector.broadcast %25 : vector<16x1xf32> to vector<16x64xf32>
    %27 = arith.subf %19, %26 : vector<16x64xf32>
    %28 = arith.mulf %27, %27 : vector<16x64xf32>
    %cst_16 = arith.constant dense<0.000000e+00> : vector<16xf32>
    %29 = vector.multi_reduction <add>, %28, %cst_16 [1] : vector<16x64xf32> to vector<16xf32>
    %30 = vector.shape_cast %29 : vector<16xf32> to vector<16x1xf32>
    %cst_17 = arith.constant 6.400000e+01 : f32
    %31 = vector.broadcast %cst_17 : f32 to vector<16x1xf32>
    %32 = arith.divf %30, %31 : vector<16x1xf32>
    %33 = vector.broadcast %25 : vector<16x1xf32> to vector<16x64xf32>
    %34 = arith.subf %19, %33 : vector<16x64xf32>
    %cst_18 = arith.constant 9.99999996E-13 : f32
    %35 = vector.broadcast %cst_18 : f32 to vector<16x1xf32>
    %36 = arith.addf %32, %35 : vector<16x1xf32>
    %37 = math.rsqrt %36 : vector<16x1xf32>
    %38 = vector.broadcast %37 : vector<16x1xf32> to vector<16x64xf32>
    %39 = arith.mulf %34, %38 : vector<16x64xf32>
    %40 = vector.broadcast %20 : vector<1x64xf32> to vector<16x64xf32>
    %41 = arith.mulf %39, %40 : vector<16x64xf32>
    %42 = vector.broadcast %21 : vector<1x64xf32> to vector<16x64xf32>
    %43 = arith.addf %41, %42 : vector<16x64xf32>
    %c0_19 = arith.constant 0 : index
    %c0_20 = arith.constant 0 : index
    %44 = vector.load %arg2[%c0_19, %c0_20] : memref<2x8xi32, #tpu.memory_space<vmem>>, vector<2x8xi32>
    %45 = arith.sitofp %44 : vector<2x8xi32> to vector<2x8xf32>
    %cst_21 = arith.constant 1.000000e+00 : f32
    %46 = vector.broadcast %cst_21 : f32 to vector<2x8xf32>
    %47 = arith.subf %46, %45 : vector<2x8xf32>
    %cst_22 = arith.constant -1.000000e+04 : f32
    %48 = vector.broadcast %cst_22 : f32 to vector<2x8xf32>
    %49 = arith.mulf %47, %48 : vector<2x8xf32>
    %50 = arith.truncf %43 : vector<16x64xf32> to vector<16x64xbf16>
    %c0_23 = arith.constant 0 : index
    %c0_24 = arith.constant 0 : index
    %c0_25 = arith.constant 0 : index
    %51 = vector.load %arg8[%c0_23, %c0_24, %c0_25] : memref<2x64x192xbf16, #tpu.memory_space<vmem>>, vector<1x64x192xbf16>
    %52 = vector.shape_cast %51 : vector<1x64x192xbf16> to vector<64x192xbf16>
    %cst_26 = arith.constant dense<0.000000e+00> : vector<16x192xf32>
    %53 = tpu.matmul %50, %52, %cst_26 {dimension_numbers = #tpu.dot_dimension_numbers<[1], [0], [0], [1], [0, 0, 1, 1], [], []>} : vector<16x64xbf16>, vector<64x192xbf16>, vector<16x192xf32> -> vector<16x192xf32>
    %c0_27 = arith.constant 0 : index
    %c0_28 = arith.constant 0 : index
    %c0_29 = arith.constant 0 : index
    %54 = vector.load %arg9[%c0_27, %c0_28, %c0_29] : memref<2x1x192xf32, #tpu.memory_space<vmem>>, vector<1x1x192xf32>
    %55 = vector.shape_cast %54 : vector<1x1x192xf32> to vector<1x192xf32>
    %56 = vector.broadcast %55 : vector<1x192xf32> to vector<16x192xf32>
    %57 = arith.addf %53, %56 : vector<16x192xf32>
    %c0_30 = arith.constant 0 : index
    %c0_31 = arith.constant 0 : index
    %c0_32 = arith.constant 0 : index
    %58 = vector.load %arg10[%c0_30, %c0_31, %c0_32] : memref<2x64x64xbf16, #tpu.memory_space<vmem>>, vector<1x64x64xbf16>
    %59 = vector.shape_cast %58 : vector<1x64x64xbf16> to vector<64x64xbf16>
    %60 = vector.extract_strided_slice %57 {offsets = [0, 0], sizes = [8, 192], strides = [1, 1]} : vector<16x192xf32> to vector<8x192xf32>
    %61 = vector.extract_strided_slice %49 {offsets = [0, 0], sizes = [1, 8], strides = [1, 1]} : vector<2x8xf32> to vector<1x8xf32>
    %cst_33 = arith.constant 0.000000e+00 : f32
    %62 = vector.broadcast %cst_33 : f32 to vector<8x64xf32>
    %63 = vector.extract_strided_slice %60 {offsets = [0, 0], sizes = [8, 32], strides = [1, 1]} : vector<8x192xf32> to vector<8x32xf32>
    %64 = vector.extract_strided_slice %60 {offsets = [0, 64], sizes = [8, 32], strides = [1, 1]} : vector<8x192xf32> to vector<8x32xf32>
    %65 = vector.extract_strided_slice %60 {offsets = [0, 128], sizes = [8, 32], strides = [1, 1]} : vector<8x192xf32> to vector<8x32xf32>
    %66 = tpu.transpose %64, [1, 0] : vector<8x32xf32> -> vector<32x8xf32>
    %cst_34 = arith.constant dense<0.000000e+00> : vector<8x8xf32>
    %67 = tpu.matmul %63, %66, %cst_34 {dimension_numbers = #tpu.dot_dimension_numbers<[1], [0], [0], [1], [0, 0, 1, 1], [], []>} : vector<8x32xf32>, vector<32x8xf32>, vector<8x8xf32> -> vector<8x8xf32>
    %cst_35 = arith.constant 0.176776692 : f32
    %68 = vector.broadcast %cst_35 : f32 to vector<8x8xf32>
    %69 = arith.mulf %67, %68 : vector<8x8xf32>
    %70 = vector.broadcast %61 : vector<1x8xf32> to vector<8x8xf32>
    %71 = arith.addf %69, %70 : vector<8x8xf32>
    %cst_36 = arith.constant dense<0xFF800000> : vector<8xf32>
    %72 = vector.multi_reduction <maximumf>, %71, %cst_36 [1] : vector<8x8xf32> to vector<8xf32>
    %73 = vector.shape_cast %72 : vector<8xf32> to vector<8x1xf32>
    %74 = vector.broadcast %73 : vector<8x1xf32> to vector<8x8xf32>
    %75 = arith.subf %71, %74 : vector<8x8xf32>
    %76 = math.exp %75 : vector<8x8xf32>
    %cst_37 = arith.constant dense<0.000000e+00> : vector<8xf32>
    %77 = vector.multi_reduction <add>, %76, %cst_37 [1] : vector<8x8xf32> to vector<8xf32>
    %78 = vector.shape_cast %77 : vector<8xf32> to vector<8x1xf32>
    %79 = tpu.reciprocal %78 {approx = true} : vector<8x1xf32> -> vector<8x1xf32>
    %80 = vector.broadcast %79 : vector<8x1xf32> to vector<8x8xf32>
    %81 = arith.mulf %76, %80 : vector<8x8xf32>
    %cst_38 = arith.constant dense<0.000000e+00> : vector<8x32xf32>
    %82 = tpu.matmul %81, %65, %cst_38 {dimension_numbers = #tpu.dot_dimension_numbers<[1], [0], [0], [1], [0, 0, 1, 1], [], []>} : vector<8x8xf32>, vector<8x32xf32>, vector<8x32xf32> -> vector<8x32xf32>
    %83 = arith.truncf %82 : vector<8x32xf32> to vector<8x32xbf16>
    %84 = vector.extract_strided_slice %59 {offsets = [0, 0], sizes = [32, 64], strides = [1, 1]} : vector<64x64xbf16> to vector<32x64xbf16>
    %cst_39 = arith.constant dense<0.000000e+00> : vector<8x64xf32>
    %85 = tpu.matmul %83, %84, %cst_39 {dimension_numbers = #tpu.dot_dimension_numbers<[1], [0], [0], [1], [0, 0, 1, 1], [], []>} : vector<8x32xbf16>, vector<32x64xbf16>, vector<8x64xf32> -> vector<8x64xf32>
    %86 = arith.addf %62, %85 : vector<8x64xf32>
    %87 = vector.extract_strided_slice %60 {offsets = [0, 32], sizes = [8, 32], strides = [1, 1]} : vector<8x192xf32> to vector<8x32xf32>
    %88 = vector.extract_strided_slice %60 {offsets = [0, 96], sizes = [8, 32], strides = [1, 1]} : vector<8x192xf32> to vector<8x32xf32>
    %89 = vector.extract_strided_slice %60 {offsets = [0, 160], sizes = [8, 32], strides = [1, 1]} : vector<8x192xf32> to vector<8x32xf32>
    %90 = tpu.transpose %88, [1, 0] : vector<8x32xf32> -> vector<32x8xf32>
    %cst_40 = arith.constant dense<0.000000e+00> : vector<8x8xf32>
    %91 = tpu.matmul %87, %90, %cst_40 {dimension_numbers = #tpu.dot_dimension_numbers<[1], [0], [0], [1], [0, 0, 1, 1], [], []>} : vector<8x32xf32>, vector<32x8xf32>, vector<8x8xf32> -> vector<8x8xf32>
    %cst_41 = arith.constant 0.176776692 : f32
    %92 = vector.broadcast %cst_41 : f32 to vector<8x8xf32>
    %93 = arith.mulf %91, %92 : vector<8x8xf32>
    %94 = vector.broadcast %61 : vector<1x8xf32> to vector<8x8xf32>
    %95 = arith.addf %93, %94 : vector<8x8xf32>
    %cst_42 = arith.constant dense<0xFF800000> : vector<8xf32>
    %96 = vector.multi_reduction <maximumf>, %95, %cst_42 [1] : vector<8x8xf32> to vector<8xf32>
    %97 = vector.shape_cast %96 : vector<8xf32> to vector<8x1xf32>
    %98 = vector.broadcast %97 : vector<8x1xf32> to vector<8x8xf32>
    %99 = arith.subf %95, %98 : vector<8x8xf32>
    %100 = math.exp %99 : vector<8x8xf32>
    %cst_43 = arith.constant dense<0.000000e+00> : vector<8xf32>
    %101 = vector.multi_reduction <add>, %100, %cst_43 [1] : vector<8x8xf32> to vector<8xf32>
    %102 = vector.shape_cast %101 : vector<8xf32> to vector<8x1xf32>
    %103 = tpu.reciprocal %102 {approx = true} : vector<8x1xf32> -> vector<8x1xf32>
    %104 = vector.broadcast %103 : vector<8x1xf32> to vector<8x8xf32>
    %105 = arith.mulf %100, %104 : vector<8x8xf32>
    %cst_44 = arith.constant dense<0.000000e+00> : vector<8x32xf32>
    %106 = tpu.matmul %105, %89, %cst_44 {dimension_numbers = #tpu.dot_dimension_numbers<[1], [0], [0], [1], [0, 0, 1, 1], [], []>} : vector<8x8xf32>, vector<8x32xf32>, vector<8x32xf32> -> vector<8x32xf32>
    %107 = arith.truncf %106 : vector<8x32xf32> to vector<8x32xbf16>
    %108 = vector.extract_strided_slice %59 {offsets = [32, 0], sizes = [32, 64], strides = [1, 1]} : vector<64x64xbf16> to vector<32x64xbf16>
    %cst_45 = arith.constant dense<0.000000e+00> : vector<8x64xf32>
    %109 = tpu.matmul %107, %108, %cst_45 {dimension_numbers = #tpu.dot_dimension_numbers<[1], [0], [0], [1], [0, 0, 1, 1], [], []>} : vector<8x32xbf16>, vector<32x64xbf16>, vector<8x64xf32> -> vector<8x64xf32>
    %110 = arith.addf %86, %109 : vector<8x64xf32>
    %111 = vector.extract_strided_slice %57 {offsets = [8, 0], sizes = [8, 192], strides = [1, 1]} : vector<16x192xf32> to vector<8x192xf32>
    %112 = vector.extract_strided_slice %49 {offsets = [1, 0], sizes = [1, 8], strides = [1, 1]} : vector<2x8xf32> to vector<1x8xf32>
    %cst_46 = arith.constant 0.000000e+00 : f32
    %113 = vector.broadcast %cst_46 : f32 to vector<8x64xf32>
    %114 = vector.extract_strided_slice %111 {offsets = [0, 0], sizes = [8, 32], strides = [1, 1]} : vector<8x192xf32> to vector<8x32xf32>
    %115 = vector.extract_strided_slice %111 {offsets = [0, 64], sizes = [8, 32], strides = [1, 1]} : vector<8x192xf32> to vector<8x32xf32>
    %116 = vector.extract_strided_slice %111 {offsets = [0, 128], sizes = [8, 32], strides = [1, 1]} : vector<8x192xf32> to vector<8x32xf32>
    %117 = tpu.transpose %115, [1, 0] : vector<8x32xf32> -> vector<32x8xf32>
    %cst_47 = arith.constant dense<0.000000e+00> : vector<8x8xf32>
    %118 = tpu.matmul %114, %117, %cst_47 {dimension_numbers = #tpu.dot_dimension_numbers<[1], [0], [0], [1], [0, 0, 1, 1], [], []>} : vector<8x32xf32>, vector<32x8xf32>, vector<8x8xf32> -> vector<8x8xf32>
    %cst_48 = arith.constant 0.176776692 : f32
    %119 = vector.broadcast %cst_48 : f32 to vector<8x8xf32>
    %120 = arith.mulf %118, %119 : vector<8x8xf32>
    %121 = vector.broadcast %112 : vector<1x8xf32> to vector<8x8xf32>
    %122 = arith.addf %120, %121 : vector<8x8xf32>
    %cst_49 = arith.constant dense<0xFF800000> : vector<8xf32>
    %123 = vector.multi_reduction <maximumf>, %122, %cst_49 [1] : vector<8x8xf32> to vector<8xf32>
    %124 = vector.shape_cast %123 : vector<8xf32> to vector<8x1xf32>
    %125 = vector.broadcast %124 : vector<8x1xf32> to vector<8x8xf32>
    %126 = arith.subf %122, %125 : vector<8x8xf32>
    %127 = math.exp %126 : vector<8x8xf32>
    %cst_50 = arith.constant dense<0.000000e+00> : vector<8xf32>
    %128 = vector.multi_reduction <add>, %127, %cst_50 [1] : vector<8x8xf32> to vector<8xf32>
    %129 = vector.shape_cast %128 : vector<8xf32> to vector<8x1xf32>
    %130 = tpu.reciprocal %129 {approx = true} : vector<8x1xf32> -> vector<8x1xf32>
    %131 = vector.broadcast %130 : vector<8x1xf32> to vector<8x8xf32>
    %132 = arith.mulf %127, %131 : vector<8x8xf32>
    %cst_51 = arith.constant dense<0.000000e+00> : vector<8x32xf32>
    %133 = tpu.matmul %132, %116, %cst_51 {dimension_numbers = #tpu.dot_dimension_numbers<[1], [0], [0], [1], [0, 0, 1, 1], [], []>} : vector<8x8xf32>, vector<8x32xf32>, vector<8x32xf32> -> vector<8x32xf32>
    %134 = arith.truncf %133 : vector<8x32xf32> to vector<8x32xbf16>
    %135 = vector.extract_strided_slice %59 {offsets = [0, 0], sizes = [32, 64], strides = [1, 1]} : vector<64x64xbf16> to vector<32x64xbf16>
    %cst_52 = arith.constant dense<0.000000e+00> : vector<8x64xf32>
    %136 = tpu.matmul %134, %135, %cst_52 {dimension_numbers = #tpu.dot_dimension_numbers<[1], [0], [0], [1], [0, 0, 1, 1], [], []>} : vector<8x32xbf16>, vector<32x64xbf16>, vector<8x64xf32> -> vector<8x64xf32>
    %137 = arith.addf %113, %136 : vector<8x64xf32>
    %138 = vector.extract_strided_slice %111 {offsets = [0, 32], sizes = [8, 32], strides = [1, 1]} : vector<8x192xf32> to vector<8x32xf32>
    %139 = vector.extract_strided_slice %111 {offsets = [0, 96], sizes = [8, 32], strides = [1, 1]} : vector<8x192xf32> to vector<8x32xf32>
    %140 = vector.extract_strided_slice %111 {offsets = [0, 160], sizes = [8, 32], strides = [1, 1]} : vector<8x192xf32> to vector<8x32xf32>
    %141 = tpu.transpose %139, [1, 0] : vector<8x32xf32> -> vector<32x8xf32>
    %cst_53 = arith.constant dense<0.000000e+00> : vector<8x8xf32>
    %142 = tpu.matmul %138, %141, %cst_53 {dimension_numbers = #tpu.dot_dimension_numbers<[1], [0], [0], [1], [0, 0, 1, 1], [], []>} : vector<8x32xf32>, vector<32x8xf32>, vector<8x8xf32> -> vector<8x8xf32>
    %cst_54 = arith.constant 0.176776692 : f32
    %143 = vector.broadcast %cst_54 : f32 to vector<8x8xf32>
    %144 = arith.mulf %142, %143 : vector<8x8xf32>
    %145 = vector.broadcast %112 : vector<1x8xf32> to vector<8x8xf32>
    %146 = arith.addf %144, %145 : vector<8x8xf32>
    %cst_55 = arith.constant dense<0xFF800000> : vector<8xf32>
    %147 = vector.multi_reduction <maximumf>, %146, %cst_55 [1] : vector<8x8xf32> to vector<8xf32>
    %148 = vector.shape_cast %147 : vector<8xf32> to vector<8x1xf32>
    %149 = vector.broadcast %148 : vector<8x1xf32> to vector<8x8xf32>
    %150 = arith.subf %146, %149 : vector<8x8xf32>
    %151 = math.exp %150 : vector<8x8xf32>
    %cst_56 = arith.constant dense<0.000000e+00> : vector<8xf32>
    %152 = vector.multi_reduction <add>, %151, %cst_56 [1] : vector<8x8xf32> to vector<8xf32>
    %153 = vector.shape_cast %152 : vector<8xf32> to vector<8x1xf32>
    %154 = tpu.reciprocal %153 {approx = true} : vector<8x1xf32> -> vector<8x1xf32>
    %155 = vector.broadcast %154 : vector<8x1xf32> to vector<8x8xf32>
    %156 = arith.mulf %151, %155 : vector<8x8xf32>
    %cst_57 = arith.constant dense<0.000000e+00> : vector<8x32xf32>
    %157 = tpu.matmul %156, %140, %cst_57 {dimension_numbers = #tpu.dot_dimension_numbers<[1], [0], [0], [1], [0, 0, 1, 1], [], []>} : vector<8x8xf32>, vector<8x32xf32>, vector<8x32xf32> -> vector<8x32xf32>
    %158 = arith.truncf %157 : vector<8x32xf32> to vector<8x32xbf16>
    %159 = vector.extract_strided_slice %59 {offsets = [32, 0], sizes = [32, 64], strides = [1, 1]} : vector<64x64xbf16> to vector<32x64xbf16>
    %cst_58 = arith.constant dense<0.000000e+00> : vector<8x64xf32>
    %160 = tpu.matmul %158, %159, %cst_58 {dimension_numbers = #tpu.dot_dimension_numbers<[1], [0], [0], [1], [0, 0, 1, 1], [], []>} : vector<8x32xbf16>, vector<32x64xbf16>, vector<8x64xf32> -> vector<8x64xf32>
    %161 = arith.addf %137, %160 : vector<8x64xf32>
    %162 = tpu.concatenate %110, %161 in 0 : vector<8x64xf32>, vector<8x64xf32> -> vector<16x64xf32>
    %c0_59 = arith.constant 0 : index
    %c0_60 = arith.constant 0 : index
    %c0_61 = arith.constant 0 : index
    %163 = vector.load %arg11[%c0_59, %c0_60, %c0_61] : memref<2x1x64xf32, #tpu.memory_space<vmem>>, vector<1x1x64xf32>
    %164 = vector.shape_cast %163 : vector<1x1x64xf32> to vector<1x64xf32>
    %165 = vector.broadcast %164 : vector<1x64xf32> to vector<16x64xf32>
    %166 = arith.addf %162, %165 : vector<16x64xf32>
    %167 = arith.addf %43, %166 : vector<16x64xf32>
    %c0_62 = arith.constant 0 : index
    %c0_63 = arith.constant 0 : index
    %c0_64 = arith.constant 0 : index
    %168 = vector.load %arg12[%c0_62, %c0_63, %c0_64] : memref<2x1x64xf32, #tpu.memory_space<vmem>>, vector<1x1x64xf32>
    %169 = vector.shape_cast %168 : vector<1x1x64xf32> to vector<1x64xf32>
    %c0_65 = arith.constant 0 : index
    %c0_66 = arith.constant 0 : index
    %c0_67 = arith.constant 0 : index
    %170 = vector.load %arg13[%c0_65, %c0_66, %c0_67] : memref<2x1x64xf32, #tpu.memory_space<vmem>>, vector<1x1x64xf32>
    %171 = vector.shape_cast %170 : vector<1x1x64xf32> to vector<1x64xf32>
    %cst_68 = arith.constant dense<0.000000e+00> : vector<16xf32>
    %172 = vector.multi_reduction <add>, %167, %cst_68 [1] : vector<16x64xf32> to vector<16xf32>
    %173 = vector.shape_cast %172 : vector<16xf32> to vector<16x1xf32>
    %cst_69 = arith.constant 6.400000e+01 : f32
    %174 = vector.broadcast %cst_69 : f32 to vector<16x1xf32>
    %175 = arith.divf %173, %174 : vector<16x1xf32>
    %176 = vector.broadcast %175 : vector<16x1xf32> to vector<16x64xf32>
    %177 = arith.subf %167, %176 : vector<16x64xf32>
    %178 = arith.mulf %177, %177 : vector<16x64xf32>
    %cst_70 = arith.constant dense<0.000000e+00> : vector<16xf32>
    %179 = vector.multi_reduction <add>, %178, %cst_70 [1] : vector<16x64xf32> to vector<16xf32>
    %180 = vector.shape_cast %179 : vector<16xf32> to vector<16x1xf32>
    %cst_71 = arith.constant 6.400000e+01 : f32
    %181 = vector.broadcast %cst_71 : f32 to vector<16x1xf32>
    %182 = arith.divf %180, %181 : vector<16x1xf32>
    %183 = vector.broadcast %175 : vector<16x1xf32> to vector<16x64xf32>
    %184 = arith.subf %167, %183 : vector<16x64xf32>
    %cst_72 = arith.constant 9.99999996E-13 : f32
    %185 = vector.broadcast %cst_72 : f32 to vector<16x1xf32>
    %186 = arith.addf %182, %185 : vector<16x1xf32>
    %187 = math.rsqrt %186 : vector<16x1xf32>
    %188 = vector.broadcast %187 : vector<16x1xf32> to vector<16x64xf32>
    %189 = arith.mulf %184, %188 : vector<16x64xf32>
    %190 = vector.broadcast %169 : vector<1x64xf32> to vector<16x64xf32>
    %191 = arith.mulf %189, %190 : vector<16x64xf32>
    %192 = vector.broadcast %171 : vector<1x64xf32> to vector<16x64xf32>
    %193 = arith.addf %191, %192 : vector<16x64xf32>
    %194 = arith.truncf %193 : vector<16x64xf32> to vector<16x64xbf16>
    %c0_73 = arith.constant 0 : index
    %c0_74 = arith.constant 0 : index
    %c0_75 = arith.constant 0 : index
    %195 = vector.load %arg14[%c0_73, %c0_74, %c0_75] : memref<2x64x128xbf16, #tpu.memory_space<vmem>>, vector<1x64x128xbf16>
    %196 = vector.shape_cast %195 : vector<1x64x128xbf16> to vector<64x128xbf16>
    %cst_76 = arith.constant dense<0.000000e+00> : vector<16x128xf32>
    %197 = tpu.matmul %194, %196, %cst_76 {dimension_numbers = #tpu.dot_dimension_numbers<[1], [0], [0], [1], [0, 0, 1, 1], [], []>} : vector<16x64xbf16>, vector<64x128xbf16>, vector<16x128xf32> -> vector<16x128xf32>
    %c0_77 = arith.constant 0 : index
    %c0_78 = arith.constant 0 : index
    %c0_79 = arith.constant 0 : index
    %198 = vector.load %arg15[%c0_77, %c0_78, %c0_79] : memref<2x1x128xf32, #tpu.memory_space<vmem>>, vector<1x1x128xf32>
    %199 = vector.shape_cast %198 : vector<1x1x128xf32> to vector<1x128xf32>
    %200 = vector.broadcast %199 : vector<1x128xf32> to vector<16x128xf32>
    %201 = arith.addf %197, %200 : vector<16x128xf32>
    %202 = arith.mulf %201, %201 : vector<16x128xf32>
    %203 = arith.mulf %201, %202 : vector<16x128xf32>
    %cst_80 = arith.constant 4.471500e-02 : f32
    %204 = vector.broadcast %cst_80 : f32 to vector<16x128xf32>
    %205 = arith.mulf %204, %203 : vector<16x128xf32>
    %206 = arith.addf %201, %205 : vector<16x128xf32>
    %cst_81 = arith.constant 0.797884583 : f32
    %207 = vector.broadcast %cst_81 : f32 to vector<16x128xf32>
    %208 = arith.mulf %207, %206 : vector<16x128xf32>
    %209 = math.tanh %208 : vector<16x128xf32>
    %cst_82 = arith.constant 1.000000e+00 : f32
    %210 = vector.broadcast %cst_82 : f32 to vector<16x128xf32>
    %211 = arith.addf %210, %209 : vector<16x128xf32>
    %cst_83 = arith.constant 5.000000e-01 : f32
    %212 = vector.broadcast %cst_83 : f32 to vector<16x128xf32>
    %213 = arith.mulf %212, %211 : vector<16x128xf32>
    %214 = arith.mulf %201, %213 : vector<16x128xf32>
    %215 = arith.truncf %214 : vector<16x128xf32> to vector<16x128xbf16>
    %c0_84 = arith.constant 0 : index
    %c0_85 = arith.constant 0 : index
    %c0_86 = arith.constant 0 : index
    %216 = vector.load %arg16[%c0_84, %c0_85, %c0_86] : memref<2x128x64xbf16, #tpu.memory_space<vmem>>, vector<1x128x64xbf16>
    %217 = vector.shape_cast %216 : vector<1x128x64xbf16> to vector<128x64xbf16>
    %cst_87 = arith.constant dense<0.000000e+00> : vector<16x64xf32>
    %218 = tpu.matmul %215, %217, %cst_87 {dimension_numbers = #tpu.dot_dimension_numbers<[1], [0], [0], [1], [0, 0, 1, 1], [], []>} : vector<16x128xbf16>, vector<128x64xbf16>, vector<16x64xf32> -> vector<16x64xf32>
    %c0_88 = arith.constant 0 : index
    %c0_89 = arith.constant 0 : index
    %c0_90 = arith.constant 0 : index
    %219 = vector.load %arg17[%c0_88, %c0_89, %c0_90] : memref<2x1x64xf32, #tpu.memory_space<vmem>>, vector<1x1x64xf32>
    %220 = vector.shape_cast %219 : vector<1x1x64xf32> to vector<1x64xf32>
    %221 = vector.broadcast %220 : vector<1x64xf32> to vector<16x64xf32>
    %222 = arith.addf %218, %221 : vector<16x64xf32>
    %223 = arith.addf %193, %222 : vector<16x64xf32>
    %c0_91 = arith.constant 0 : index
    %c0_92 = arith.constant 0 : index
    %c0_93 = arith.constant 0 : index
    %224 = vector.load %arg18[%c0_91, %c0_92, %c0_93] : memref<2x1x64xf32, #tpu.memory_space<vmem>>, vector<1x1x64xf32>
    %225 = vector.shape_cast %224 : vector<1x1x64xf32> to vector<1x64xf32>
    %c0_94 = arith.constant 0 : index
    %c0_95 = arith.constant 0 : index
    %c0_96 = arith.constant 0 : index
    %226 = vector.load %arg19[%c0_94, %c0_95, %c0_96] : memref<2x1x64xf32, #tpu.memory_space<vmem>>, vector<1x1x64xf32>
    %227 = vector.shape_cast %226 : vector<1x1x64xf32> to vector<1x64xf32>
    %cst_97 = arith.constant dense<0.000000e+00> : vector<16xf32>
    %228 = vector.multi_reduction <add>, %223, %cst_97 [1] : vector<16x64xf32> to vector<16xf32>
    %229 = vector.shape_cast %228 : vector<16xf32> to vector<16x1xf32>
    %cst_98 = arith.constant 6.400000e+01 : f32
    %230 = vector.broadcast %cst_98 : f32 to vector<16x1xf32>
    %231 = arith.divf %229, %230 : vector<16x1xf32>
    %232 = vector.broadcast %231 : vector<16x1xf32> to vector<16x64xf32>
    %233 = arith.subf %223, %232 : vector<16x64xf32>
    %234 = arith.mulf %233, %233 : vector<16x64xf32>
    %cst_99 = arith.constant dense<0.000000e+00> : vector<16xf32>
    %235 = vector.multi_reduction <add>, %234, %cst_99 [1] : vector<16x64xf32> to vector<16xf32>
    %236 = vector.shape_cast %235 : vector<16xf32> to vector<16x1xf32>
    %cst_100 = arith.constant 6.400000e+01 : f32
    %237 = vector.broadcast %cst_100 : f32 to vector<16x1xf32>
    %238 = arith.divf %236, %237 : vector<16x1xf32>
    %239 = vector.broadcast %231 : vector<16x1xf32> to vector<16x64xf32>
    %240 = arith.subf %223, %239 : vector<16x64xf32>
    %cst_101 = arith.constant 9.99999996E-13 : f32
    %241 = vector.broadcast %cst_101 : f32 to vector<16x1xf32>
    %242 = arith.addf %238, %241 : vector<16x1xf32>
    %243 = math.rsqrt %242 : vector<16x1xf32>
    %244 = vector.broadcast %243 : vector<16x1xf32> to vector<16x64xf32>
    %245 = arith.mulf %240, %244 : vector<16x64xf32>
    %246 = vector.broadcast %225 : vector<1x64xf32> to vector<16x64xf32>
    %247 = arith.mulf %245, %246 : vector<16x64xf32>
    %248 = vector.broadcast %227 : vector<1x64xf32> to vector<16x64xf32>
    %249 = arith.addf %247, %248 : vector<16x64xf32>
    %250 = arith.truncf %249 : vector<16x64xf32> to vector<16x64xbf16>
    %c1 = arith.constant 1 : index
    %c0_102 = arith.constant 0 : index
    %c0_103 = arith.constant 0 : index
    %251 = vector.load %arg8[%c1, %c0_102, %c0_103] : memref<2x64x192xbf16, #tpu.memory_space<vmem>>, vector<1x64x192xbf16>
    %252 = vector.shape_cast %251 : vector<1x64x192xbf16> to vector<64x192xbf16>
    %cst_104 = arith.constant dense<0.000000e+00> : vector<16x192xf32>
    %253 = tpu.matmul %250, %252, %cst_104 {dimension_numbers = #tpu.dot_dimension_numbers<[1], [0], [0], [1], [0, 0, 1, 1], [], []>} : vector<16x64xbf16>, vector<64x192xbf16>, vector<16x192xf32> -> vector<16x192xf32>
    %c1_105 = arith.constant 1 : index
    %c0_106 = arith.constant 0 : index
    %c0_107 = arith.constant 0 : index
    %254 = vector.load %arg9[%c1_105, %c0_106, %c0_107] : memref<2x1x192xf32, #tpu.memory_space<vmem>>, vector<1x1x192xf32>
    %255 = vector.shape_cast %254 : vector<1x1x192xf32> to vector<1x192xf32>
    %256 = vector.broadcast %255 : vector<1x192xf32> to vector<16x192xf32>
    %257 = arith.addf %253, %256 : vector<16x192xf32>
    %c1_108 = arith.constant 1 : index
    %c0_109 = arith.constant 0 : index
    %c0_110 = arith.constant 0 : index
    %258 = vector.load %arg10[%c1_108, %c0_109, %c0_110] : memref<2x64x64xbf16, #tpu.memory_space<vmem>>, vector<1x64x64xbf16>
    %259 = vector.shape_cast %258 : vector<1x64x64xbf16> to vector<64x64xbf16>
    %260 = vector.extract_strided_slice %257 {offsets = [0, 0], sizes = [8, 192], strides = [1, 1]} : vector<16x192xf32> to vector<8x192xf32>
    %261 = vector.extract_strided_slice %49 {offsets = [0, 0], sizes = [1, 8], strides = [1, 1]} : vector<2x8xf32> to vector<1x8xf32>
    %cst_111 = arith.constant 0.000000e+00 : f32
    %262 = vector.broadcast %cst_111 : f32 to vector<8x64xf32>
    %263 = vector.extract_strided_slice %260 {offsets = [0, 0], sizes = [8, 32], strides = [1, 1]} : vector<8x192xf32> to vector<8x32xf32>
    %264 = vector.extract_strided_slice %260 {offsets = [0, 64], sizes = [8, 32], strides = [1, 1]} : vector<8x192xf32> to vector<8x32xf32>
    %265 = vector.extract_strided_slice %260 {offsets = [0, 128], sizes = [8, 32], strides = [1, 1]} : vector<8x192xf32> to vector<8x32xf32>
    %266 = tpu.transpose %264, [1, 0] : vector<8x32xf32> -> vector<32x8xf32>
    %cst_112 = arith.constant dense<0.000000e+00> : vector<8x8xf32>
    %267 = tpu.matmul %263, %266, %cst_112 {dimension_numbers = #tpu.dot_dimension_numbers<[1], [0], [0], [1], [0, 0, 1, 1], [], []>} : vector<8x32xf32>, vector<32x8xf32>, vector<8x8xf32> -> vector<8x8xf32>
    %cst_113 = arith.constant 0.176776692 : f32
    %268 = vector.broadcast %cst_113 : f32 to vector<8x8xf32>
    %269 = arith.mulf %267, %268 : vector<8x8xf32>
    %270 = vector.broadcast %261 : vector<1x8xf32> to vector<8x8xf32>
    %271 = arith.addf %269, %270 : vector<8x8xf32>
    %cst_114 = arith.constant dense<0xFF800000> : vector<8xf32>
    %272 = vector.multi_reduction <maximumf>, %271, %cst_114 [1] : vector<8x8xf32> to vector<8xf32>
    %273 = vector.shape_cast %272 : vector<8xf32> to vector<8x1xf32>
    %274 = vector.broadcast %273 : vector<8x1xf32> to vector<8x8xf32>
    %275 = arith.subf %271, %274 : vector<8x8xf32>
    %276 = math.exp %275 : vector<8x8xf32>
    %cst_115 = arith.constant dense<0.000000e+00> : vector<8xf32>
    %277 = vector.multi_reduction <add>, %276, %cst_115 [1] : vector<8x8xf32> to vector<8xf32>
    %278 = vector.shape_cast %277 : vector<8xf32> to vector<8x1xf32>
    %279 = tpu.reciprocal %278 {approx = true} : vector<8x1xf32> -> vector<8x1xf32>
    %280 = vector.broadcast %279 : vector<8x1xf32> to vector<8x8xf32>
    %281 = arith.mulf %276, %280 : vector<8x8xf32>
    %cst_116 = arith.constant dense<0.000000e+00> : vector<8x32xf32>
    %282 = tpu.matmul %281, %265, %cst_116 {dimension_numbers = #tpu.dot_dimension_numbers<[1], [0], [0], [1], [0, 0, 1, 1], [], []>} : vector<8x8xf32>, vector<8x32xf32>, vector<8x32xf32> -> vector<8x32xf32>
    %283 = arith.truncf %282 : vector<8x32xf32> to vector<8x32xbf16>
    %284 = vector.extract_strided_slice %259 {offsets = [0, 0], sizes = [32, 64], strides = [1, 1]} : vector<64x64xbf16> to vector<32x64xbf16>
    %cst_117 = arith.constant dense<0.000000e+00> : vector<8x64xf32>
    %285 = tpu.matmul %283, %284, %cst_117 {dimension_numbers = #tpu.dot_dimension_numbers<[1], [0], [0], [1], [0, 0, 1, 1], [], []>} : vector<8x32xbf16>, vector<32x64xbf16>, vector<8x64xf32> -> vector<8x64xf32>
    %286 = arith.addf %262, %285 : vector<8x64xf32>
    %287 = vector.extract_strided_slice %260 {offsets = [0, 32], sizes = [8, 32], strides = [1, 1]} : vector<8x192xf32> to vector<8x32xf32>
    %288 = vector.extract_strided_slice %260 {offsets = [0, 96], sizes = [8, 32], strides = [1, 1]} : vector<8x192xf32> to vector<8x32xf32>
    %289 = vector.extract_strided_slice %260 {offsets = [0, 160], sizes = [8, 32], strides = [1, 1]} : vector<8x192xf32> to vector<8x32xf32>
    %290 = tpu.transpose %288, [1, 0] : vector<8x32xf32> -> vector<32x8xf32>
    %cst_118 = arith.constant dense<0.000000e+00> : vector<8x8xf32>
    %291 = tpu.matmul %287, %290, %cst_118 {dimension_numbers = #tpu.dot_dimension_numbers<[1], [0], [0], [1], [0, 0, 1, 1], [], []>} : vector<8x32xf32>, vector<32x8xf32>, vector<8x8xf32> -> vector<8x8xf32>
    %cst_119 = arith.constant 0.176776692 : f32
    %292 = vector.broadcast %cst_119 : f32 to vector<8x8xf32>
    %293 = arith.mulf %291, %292 : vector<8x8xf32>
    %294 = vector.broadcast %261 : vector<1x8xf32> to vector<8x8xf32>
    %295 = arith.addf %293, %294 : vector<8x8xf32>
    %cst_120 = arith.constant dense<0xFF800000> : vector<8xf32>
    %296 = vector.multi_reduction <maximumf>, %295, %cst_120 [1] : vector<8x8xf32> to vector<8xf32>
    %297 = vector.shape_cast %296 : vector<8xf32> to vector<8x1xf32>
    %298 = vector.broadcast %297 : vector<8x1xf32> to vector<8x8xf32>
    %299 = arith.subf %295, %298 : vector<8x8xf32>
    %300 = math.exp %299 : vector<8x8xf32>
    %cst_121 = arith.constant dense<0.000000e+00> : vector<8xf32>
    %301 = vector.multi_reduction <add>, %300, %cst_121 [1] : vector<8x8xf32> to vector<8xf32>
    %302 = vector.shape_cast %301 : vector<8xf32> to vector<8x1xf32>
    %303 = tpu.reciprocal %302 {approx = true} : vector<8x1xf32> -> vector<8x1xf32>
    %304 = vector.broadcast %303 : vector<8x1xf32> to vector<8x8xf32>
    %305 = arith.mulf %300, %304 : vector<8x8xf32>
    %cst_122 = arith.constant dense<0.000000e+00> : vector<8x32xf32>
    %306 = tpu.matmul %305, %289, %cst_122 {dimension_numbers = #tpu.dot_dimension_numbers<[1], [0], [0], [1], [0, 0, 1, 1], [], []>} : vector<8x8xf32>, vector<8x32xf32>, vector<8x32xf32> -> vector<8x32xf32>
    %307 = arith.truncf %306 : vector<8x32xf32> to vector<8x32xbf16>
    %308 = vector.extract_strided_slice %259 {offsets = [32, 0], sizes = [32, 64], strides = [1, 1]} : vector<64x64xbf16> to vector<32x64xbf16>
    %cst_123 = arith.constant dense<0.000000e+00> : vector<8x64xf32>
    %309 = tpu.matmul %307, %308, %cst_123 {dimension_numbers = #tpu.dot_dimension_numbers<[1], [0], [0], [1], [0, 0, 1, 1], [], []>} : vector<8x32xbf16>, vector<32x64xbf16>, vector<8x64xf32> -> vector<8x64xf32>
    %310 = arith.addf %286, %309 : vector<8x64xf32>
    %311 = vector.extract_strided_slice %257 {offsets = [8, 0], sizes = [8, 192], strides = [1, 1]} : vector<16x192xf32> to vector<8x192xf32>
    %312 = vector.extract_strided_slice %49 {offsets = [1, 0], sizes = [1, 8], strides = [1, 1]} : vector<2x8xf32> to vector<1x8xf32>
    %cst_124 = arith.constant 0.000000e+00 : f32
    %313 = vector.broadcast %cst_124 : f32 to vector<8x64xf32>
    %314 = vector.extract_strided_slice %311 {offsets = [0, 0], sizes = [8, 32], strides = [1, 1]} : vector<8x192xf32> to vector<8x32xf32>
    %315 = vector.extract_strided_slice %311 {offsets = [0, 64], sizes = [8, 32], strides = [1, 1]} : vector<8x192xf32> to vector<8x32xf32>
    %316 = vector.extract_strided_slice %311 {offsets = [0, 128], sizes = [8, 32], strides = [1, 1]} : vector<8x192xf32> to vector<8x32xf32>
    %317 = tpu.transpose %315, [1, 0] : vector<8x32xf32> -> vector<32x8xf32>
    %cst_125 = arith.constant dense<0.000000e+00> : vector<8x8xf32>
    %318 = tpu.matmul %314, %317, %cst_125 {dimension_numbers = #tpu.dot_dimension_numbers<[1], [0], [0], [1], [0, 0, 1, 1], [], []>} : vector<8x32xf32>, vector<32x8xf32>, vector<8x8xf32> -> vector<8x8xf32>
    %cst_126 = arith.constant 0.176776692 : f32
    %319 = vector.broadcast %cst_126 : f32 to vector<8x8xf32>
    %320 = arith.mulf %318, %319 : vector<8x8xf32>
    %321 = vector.broadcast %312 : vector<1x8xf32> to vector<8x8xf32>
    %322 = arith.addf %320, %321 : vector<8x8xf32>
    %cst_127 = arith.constant dense<0xFF800000> : vector<8xf32>
    %323 = vector.multi_reduction <maximumf>, %322, %cst_127 [1] : vector<8x8xf32> to vector<8xf32>
    %324 = vector.shape_cast %323 : vector<8xf32> to vector<8x1xf32>
    %325 = vector.broadcast %324 : vector<8x1xf32> to vector<8x8xf32>
    %326 = arith.subf %322, %325 : vector<8x8xf32>
    %327 = math.exp %326 : vector<8x8xf32>
    %cst_128 = arith.constant dense<0.000000e+00> : vector<8xf32>
    %328 = vector.multi_reduction <add>, %327, %cst_128 [1] : vector<8x8xf32> to vector<8xf32>
    %329 = vector.shape_cast %328 : vector<8xf32> to vector<8x1xf32>
    %330 = tpu.reciprocal %329 {approx = true} : vector<8x1xf32> -> vector<8x1xf32>
    %331 = vector.broadcast %330 : vector<8x1xf32> to vector<8x8xf32>
    %332 = arith.mulf %327, %331 : vector<8x8xf32>
    %cst_129 = arith.constant dense<0.000000e+00> : vector<8x32xf32>
    %333 = tpu.matmul %332, %316, %cst_129 {dimension_numbers = #tpu.dot_dimension_numbers<[1], [0], [0], [1], [0, 0, 1, 1], [], []>} : vector<8x8xf32>, vector<8x32xf32>, vector<8x32xf32> -> vector<8x32xf32>
    %334 = arith.truncf %333 : vector<8x32xf32> to vector<8x32xbf16>
    %335 = vector.extract_strided_slice %259 {offsets = [0, 0], sizes = [32, 64], strides = [1, 1]} : vector<64x64xbf16> to vector<32x64xbf16>
    %cst_130 = arith.constant dense<0.000000e+00> : vector<8x64xf32>
    %336 = tpu.matmul %334, %335, %cst_130 {dimension_numbers = #tpu.dot_dimension_numbers<[1], [0], [0], [1], [0, 0, 1, 1], [], []>} : vector<8x32xbf16>, vector<32x64xbf16>, vector<8x64xf32> -> vector<8x64xf32>
    %337 = arith.addf %313, %336 : vector<8x64xf32>
    %338 = vector.extract_strided_slice %311 {offsets = [0, 32], sizes = [8, 32], strides = [1, 1]} : vector<8x192xf32> to vector<8x32xf32>
    %339 = vector.extract_strided_slice %311 {offsets = [0, 96], sizes = [8, 32], strides = [1, 1]} : vector<8x192xf32> to vector<8x32xf32>
    %340 = vector.extract_strided_slice %311 {offsets = [0, 160], sizes = [8, 32], strides = [1, 1]} : vector<8x192xf32> to vector<8x32xf32>
    %341 = tpu.transpose %339, [1, 0] : vector<8x32xf32> -> vector<32x8xf32>
    %cst_131 = arith.constant dense<0.000000e+00> : vector<8x8xf32>
    %342 = tpu.matmul %338, %341, %cst_131 {dimension_numbers = #tpu.dot_dimension_numbers<[1], [0], [0], [1], [0, 0, 1, 1], [], []>} : vector<8x32xf32>, vector<32x8xf32>, vector<8x8xf32> -> vector<8x8xf32>
    %cst_132 = arith.constant 0.176776692 : f32
    %343 = vector.broadcast %cst_132 : f32 to vector<8x8xf32>
    %344 = arith.mulf %342, %343 : vector<8x8xf32>
    %345 = vector.broadcast %312 : vector<1x8xf32> to vector<8x8xf32>
    %346 = arith.addf %344, %345 : vector<8x8xf32>
    %cst_133 = arith.constant dense<0xFF800000> : vector<8xf32>
    %347 = vector.multi_reduction <maximumf>, %346, %cst_133 [1] : vector<8x8xf32> to vector<8xf32>
    %348 = vector.shape_cast %347 : vector<8xf32> to vector<8x1xf32>
    %349 = vector.broadcast %348 : vector<8x1xf32> to vector<8x8xf32>
    %350 = arith.subf %346, %349 : vector<8x8xf32>
    %351 = math.exp %350 : vector<8x8xf32>
    %cst_134 = arith.constant dense<0.000000e+00> : vector<8xf32>
    %352 = vector.multi_reduction <add>, %351, %cst_134 [1] : vector<8x8xf32> to vector<8xf32>
    %353 = vector.shape_cast %352 : vector<8xf32> to vector<8x1xf32>
    %354 = tpu.reciprocal %353 {approx = true} : vector<8x1xf32> -> vector<8x1xf32>
    %355 = vector.broadcast %354 : vector<8x1xf32> to vector<8x8xf32>
    %356 = arith.mulf %351, %355 : vector<8x8xf32>
    %cst_135 = arith.constant dense<0.000000e+00> : vector<8x32xf32>
    %357 = tpu.matmul %356, %340, %cst_135 {dimension_numbers = #tpu.dot_dimension_numbers<[1], [0], [0], [1], [0, 0, 1, 1], [], []>} : vector<8x8xf32>, vector<8x32xf32>, vector<8x32xf32> -> vector<8x32xf32>
    %358 = arith.truncf %357 : vector<8x32xf32> to vector<8x32xbf16>
    %359 = vector.extract_strided_slice %259 {offsets = [32, 0], sizes = [32, 64], strides = [1, 1]} : vector<64x64xbf16> to vector<32x64xbf16>
    %cst_136 = arith.constant dense<0.000000e+00> : vector<8x64xf32>
    %360 = tpu.matmul %358, %359, %cst_136 {dimension_numbers = #tpu.dot_dimension_numbers<[1], [0], [0], [1], [0, 0, 1, 1], [], []>} : vector<8x32xbf16>, vector<32x64xbf16>, vector<8x64xf32> -> vector<8x64xf32>
    %361 = arith.addf %337, %360 : vector<8x64xf32>
    %362 = tpu.concatenate %310, %361 in 0 : vector<8x64xf32>, vector<8x64xf32> -> vector<16x64xf32>
    %c1_137 = arith.constant 1 : index
    %c0_138 = arith.constant 0 : index
    %c0_139 = arith.constant 0 : index
    %363 = vector.load %arg11[%c1_137, %c0_138, %c0_139] : memref<2x1x64xf32, #tpu.memory_space<vmem>>, vector<1x1x64xf32>
    %364 = vector.shape_cast %363 : vector<1x1x64xf32> to vector<1x64xf32>
    %365 = vector.broadcast %364 : vector<1x64xf32> to vector<16x64xf32>
    %366 = arith.addf %362, %365 : vector<16x64xf32>
    %367 = arith.addf %249, %366 : vector<16x64xf32>
    %c1_140 = arith.constant 1 : index
    %c0_141 = arith.constant 0 : index
    %c0_142 = arith.constant 0 : index
    %368 = vector.load %arg12[%c1_140, %c0_141, %c0_142] : memref<2x1x64xf32, #tpu.memory_space<vmem>>, vector<1x1x64xf32>
    %369 = vector.shape_cast %368 : vector<1x1x64xf32> to vector<1x64xf32>
    %c1_143 = arith.constant 1 : index
    %c0_144 = arith.constant 0 : index
    %c0_145 = arith.constant 0 : index
    %370 = vector.load %arg13[%c1_143, %c0_144, %c0_145] : memref<2x1x64xf32, #tpu.memory_space<vmem>>, vector<1x1x64xf32>
    %371 = vector.shape_cast %370 : vector<1x1x64xf32> to vector<1x64xf32>
    %cst_146 = arith.constant dense<0.000000e+00> : vector<16xf32>
    %372 = vector.multi_reduction <add>, %367, %cst_146 [1] : vector<16x64xf32> to vector<16xf32>
    %373 = vector.shape_cast %372 : vector<16xf32> to vector<16x1xf32>
    %cst_147 = arith.constant 6.400000e+01 : f32
    %374 = vector.broadcast %cst_147 : f32 to vector<16x1xf32>
    %375 = arith.divf %373, %374 : vector<16x1xf32>
    %376 = vector.broadcast %375 : vector<16x1xf32> to vector<16x64xf32>
    %377 = arith.subf %367, %376 : vector<16x64xf32>
    %378 = arith.mulf %377, %377 : vector<16x64xf32>
    %cst_148 = arith.constant dense<0.000000e+00> : vector<16xf32>
    %379 = vector.multi_reduction <add>, %378, %cst_148 [1] : vector<16x64xf32> to vector<16xf32>
    %380 = vector.shape_cast %379 : vector<16xf32> to vector<16x1xf32>
    %cst_149 = arith.constant 6.400000e+01 : f32
    %381 = vector.broadcast %cst_149 : f32 to vector<16x1xf32>
    %382 = arith.divf %380, %381 : vector<16x1xf32>
    %383 = vector.broadcast %375 : vector<16x1xf32> to vector<16x64xf32>
    %384 = arith.subf %367, %383 : vector<16x64xf32>
    %cst_150 = arith.constant 9.99999996E-13 : f32
    %385 = vector.broadcast %cst_150 : f32 to vector<16x1xf32>
    %386 = arith.addf %382, %385 : vector<16x1xf32>
    %387 = math.rsqrt %386 : vector<16x1xf32>
    %388 = vector.broadcast %387 : vector<16x1xf32> to vector<16x64xf32>
    %389 = arith.mulf %384, %388 : vector<16x64xf32>
    %390 = vector.broadcast %369 : vector<1x64xf32> to vector<16x64xf32>
    %391 = arith.mulf %389, %390 : vector<16x64xf32>
    %392 = vector.broadcast %371 : vector<1x64xf32> to vector<16x64xf32>
    %393 = arith.addf %391, %392 : vector<16x64xf32>
    %394 = arith.truncf %393 : vector<16x64xf32> to vector<16x64xbf16>
    %c1_151 = arith.constant 1 : index
    %c0_152 = arith.constant 0 : index
    %c0_153 = arith.constant 0 : index
    %395 = vector.load %arg14[%c1_151, %c0_152, %c0_153] : memref<2x64x128xbf16, #tpu.memory_space<vmem>>, vector<1x64x128xbf16>
    %396 = vector.shape_cast %395 : vector<1x64x128xbf16> to vector<64x128xbf16>
    %cst_154 = arith.constant dense<0.000000e+00> : vector<16x128xf32>
    %397 = tpu.matmul %394, %396, %cst_154 {dimension_numbers = #tpu.dot_dimension_numbers<[1], [0], [0], [1], [0, 0, 1, 1], [], []>} : vector<16x64xbf16>, vector<64x128xbf16>, vector<16x128xf32> -> vector<16x128xf32>
    %c1_155 = arith.constant 1 : index
    %c0_156 = arith.constant 0 : index
    %c0_157 = arith.constant 0 : index
    %398 = vector.load %arg15[%c1_155, %c0_156, %c0_157] : memref<2x1x128xf32, #tpu.memory_space<vmem>>, vector<1x1x128xf32>
    %399 = vector.shape_cast %398 : vector<1x1x128xf32> to vector<1x128xf32>
    %400 = vector.broadcast %399 : vector<1x128xf32> to vector<16x128xf32>
    %401 = arith.addf %397, %400 : vector<16x128xf32>
    %402 = arith.mulf %401, %401 : vector<16x128xf32>
    %403 = arith.mulf %401, %402 : vector<16x128xf32>
    %cst_158 = arith.constant 4.471500e-02 : f32
    %404 = vector.broadcast %cst_158 : f32 to vector<16x128xf32>
    %405 = arith.mulf %404, %403 : vector<16x128xf32>
    %406 = arith.addf %401, %405 : vector<16x128xf32>
    %cst_159 = arith.constant 0.797884583 : f32
    %407 = vector.broadcast %cst_159 : f32 to vector<16x128xf32>
    %408 = arith.mulf %407, %406 : vector<16x128xf32>
    %409 = math.tanh %408 : vector<16x128xf32>
    %cst_160 = arith.constant 1.000000e+00 : f32
    %410 = vector.broadcast %cst_160 : f32 to vector<16x128xf32>
    %411 = arith.addf %410, %409 : vector<16x128xf32>
    %cst_161 = arith.constant 5.000000e-01 : f32
    %412 = vector.broadcast %cst_161 : f32 to vector<16x128xf32>
    %413 = arith.mulf %412, %411 : vector<16x128xf32>
    %414 = arith.mulf %401, %413 : vector<16x128xf32>
    %415 = arith.truncf %414 : vector<16x128xf32> to vector<16x128xbf16>
    %c1_162 = arith.constant 1 : index
    %c0_163 = arith.constant 0 : index
    %c0_164 = arith.constant 0 : index
    %416 = vector.load %arg16[%c1_162, %c0_163, %c0_164] : memref<2x128x64xbf16, #tpu.memory_space<vmem>>, vector<1x128x64xbf16>
    %417 = vector.shape_cast %416 : vector<1x128x64xbf16> to vector<128x64xbf16>
    %cst_165 = arith.constant dense<0.000000e+00> : vector<16x64xf32>
    %418 = tpu.matmul %415, %417, %cst_165 {dimension_numbers = #tpu.dot_dimension_numbers<[1], [0], [0], [1], [0, 0, 1, 1], [], []>} : vector<16x128xbf16>, vector<128x64xbf16>, vector<16x64xf32> -> vector<16x64xf32>
    %c1_166 = arith.constant 1 : index
    %c0_167 = arith.constant 0 : index
    %c0_168 = arith.constant 0 : index
    %419 = vector.load %arg17[%c1_166, %c0_167, %c0_168] : memref<2x1x64xf32, #tpu.memory_space<vmem>>, vector<1x1x64xf32>
    %420 = vector.shape_cast %419 : vector<1x1x64xf32> to vector<1x64xf32>
    %421 = vector.broadcast %420 : vector<1x64xf32> to vector<16x64xf32>
    %422 = arith.addf %418, %421 : vector<16x64xf32>
    %423 = arith.addf %393, %422 : vector<16x64xf32>
    %c1_169 = arith.constant 1 : index
    %c0_170 = arith.constant 0 : index
    %c0_171 = arith.constant 0 : index
    %424 = vector.load %arg18[%c1_169, %c0_170, %c0_171] : memref<2x1x64xf32, #tpu.memory_space<vmem>>, vector<1x1x64xf32>
    %425 = vector.shape_cast %424 : vector<1x1x64xf32> to vector<1x64xf32>
    %c1_172 = arith.constant 1 : index
    %c0_173 = arith.constant 0 : index
    %c0_174 = arith.constant 0 : index
    %426 = vector.load %arg19[%c1_172, %c0_173, %c0_174] : memref<2x1x64xf32, #tpu.memory_space<vmem>>, vector<1x1x64xf32>
    %427 = vector.shape_cast %426 : vector<1x1x64xf32> to vector<1x64xf32>
    %cst_175 = arith.constant dense<0.000000e+00> : vector<16xf32>
    %428 = vector.multi_reduction <add>, %423, %cst_175 [1] : vector<16x64xf32> to vector<16xf32>
    %429 = vector.shape_cast %428 : vector<16xf32> to vector<16x1xf32>
    %cst_176 = arith.constant 6.400000e+01 : f32
    %430 = vector.broadcast %cst_176 : f32 to vector<16x1xf32>
    %431 = arith.divf %429, %430 : vector<16x1xf32>
    %432 = vector.broadcast %431 : vector<16x1xf32> to vector<16x64xf32>
    %433 = arith.subf %423, %432 : vector<16x64xf32>
    %434 = arith.mulf %433, %433 : vector<16x64xf32>
    %cst_177 = arith.constant dense<0.000000e+00> : vector<16xf32>
    %435 = vector.multi_reduction <add>, %434, %cst_177 [1] : vector<16x64xf32> to vector<16xf32>
    %436 = vector.shape_cast %435 : vector<16xf32> to vector<16x1xf32>
    %cst_178 = arith.constant 6.400000e+01 : f32
    %437 = vector.broadcast %cst_178 : f32 to vector<16x1xf32>
    %438 = arith.divf %436, %437 : vector<16x1xf32>
    %439 = vector.broadcast %431 : vector<16x1xf32> to vector<16x64xf32>
    %440 = arith.subf %423, %439 : vector<16x64xf32>
    %cst_179 = arith.constant 9.99999996E-13 : f32
    %441 = vector.broadcast %cst_179 : f32 to vector<16x1xf32>
    %442 = arith.addf %438, %441 : vector<16x1xf32>
    %443 = math.rsqrt %442 : vector<16x1xf32>
    %444 = vector.broadcast %443 : vector<16x1xf32> to vector<16x64xf32>
    %445 = arith.mulf %440, %444 : vector<16x64xf32>
    %446 = vector.broadcast %425 : vector<1x64xf32> to vector<16x64xf32>
    %447 = arith.mulf %445, %446 : vector<16x64xf32>
    %448 = vector.broadcast %427 : vector<1x64xf32> to vector<16x64xf32>
    %449 = arith.addf %447, %448 : vector<16x64xf32>
    %450 = vector.extract_strided_slice %449 {offsets = [0, 0], sizes = [1, 64], strides = [1, 1]} : vector<16x64xf32> to vector<1x64xf32>
    %451 = vector.extract_strided_slice %449 {offsets = [8, 0], sizes = [1, 64], strides = [1, 1]} : vector<16x64xf32> to vector<1x64xf32>
    %452 = tpu.concatenate %450, %451 in 0 : vector<1x64xf32>, vector<1x64xf32> -> vector<2x64xf32>
    %453 = arith.truncf %452 : vector<2x64xf32> to vector<2x64xbf16>
    %c0_180 = arith.constant 0 : index
    %c0_181 = arith.constant 0 : index
    %454 = vector.load %arg20[%c0_180, %c0_181] : memref<64x64xbf16, #tpu.memory_space<vmem>>, vector<64x64xbf16>
    %cst_182 = arith.constant dense<0.000000e+00> : vector<2x64xf32>
    %455 = tpu.matmul %453, %454, %cst_182 {dimension_numbers = #tpu.dot_dimension_numbers<[1], [0], [0], [1], [0, 0, 1, 1], [], []>} : vector<2x64xbf16>, vector<64x64xbf16>, vector<2x64xf32> -> vector<2x64xf32>
    %c0_183 = arith.constant 0 : index
    %c0_184 = arith.constant 0 : index
    %456 = vector.load %arg21[%c0_183, %c0_184] : memref<1x64xf32, #tpu.memory_space<vmem>>, vector<1x64xf32>
    %457 = vector.broadcast %456 : vector<1x64xf32> to vector<2x64xf32>
    %458 = arith.addf %455, %457 : vector<2x64xf32>
    %459 = math.tanh %458 : vector<2x64xf32>
    %460 = arith.truncf %459 : vector<2x64xf32> to vector<2x64xbf16>
    %c0_185 = arith.constant 0 : index
    %c0_186 = arith.constant 0 : index
    %461 = vector.load %arg22[%c0_185, %c0_186] : memref<64x3xbf16, #tpu.memory_space<vmem>>, vector<64x3xbf16>
    %cst_187 = arith.constant dense<0.000000e+00> : vector<2x3xf32>
    %462 = tpu.matmul %460, %461, %cst_187 {dimension_numbers = #tpu.dot_dimension_numbers<[1], [0], [0], [1], [0, 0, 1, 1], [], []>} : vector<2x64xbf16>, vector<64x3xbf16>, vector<2x3xf32> -> vector<2x3xf32>
    %c0_188 = arith.constant 0 : index
    %c0_189 = arith.constant 0 : index
    %463 = vector.load %arg23[%c0_188, %c0_189] : memref<1x3xf32, #tpu.memory_space<vmem>>, vector<1x3xf32>
    %464 = vector.broadcast %463 : vector<1x3xf32> to vector<2x3xf32>
    %465 = arith.addf %462, %464 : vector<2x3xf32>
    %c0_190 = arith.constant 0 : index
    %c0_191 = arith.constant 0 : index
    %466 = vector.load %arg24[%c0_190, %c0_191] : memref<2x3xf32, #tpu.memory_space<vmem>>, vector<2x3xf32>
    tpu.vector_store %arg24[%c0_190, %c0_191], %465 {strides = array<i32>} : memref<2x3xf32, #tpu.memory_space<vmem>>, vector<2x3xf32>,
    return
  }
}

</mosaic_0001>

<bundles_post_ra>
// kernel: squeeze.1
= control target key start
LH: loop header
LB: loop body
LE: loop exit
PB: predicated region body
PF: predicated region fallthrough
CT: control target
= control target key end

     0   :  { %s67_s8 = smov 125   ;;  %vm8_vm0 = vcmask 7168   ;;  %s68_s11 = smov 126   ;;  %s118_s0 = inlined_call_operand.vmem [shape: s32[2,1,8], index: 0, kind: input, shape index: {}]   ;;  %s119_s1 = inlined_call_operand.vmem [shape: s32[16,1], index: 1, kind: output, shape index: {}]  }
   0x1   :  { %v5_v0 = vld [vmem:[%s118_s0] sm:$0x3]  ;;  %s66_s0 = smov 127   ;;  %s69_s12 = smov 124  }
   0x2   :  { %6 = vst [vmem:[#allocation0] sm:$0x3] %v5_v0  ;;  %s70_s13 = smov 123   ;;  %s71_s14 = smov 122  }
   0x3   :  { %s72_s15 = smov 121  }
   0x9   :  { %v10_v1 = vld [vmem:[#allocation0] sm:$0x3]  }
   0xa   :  { %v22_v2 = vld [vmem:[#allocation0] sm:$0x3]   ;;  %11 = vrot.lane.b32.xlu0 %v10_v1, %s66_s0 }
   0xb   :  { %23 = vrot.lane.b32.xlu1 %v22_v2, %s67_s8  ;;  %v16_v3 = vld [vmem:[#allocation0] sm:$0x3]  }
   0xc   :  { %v28_v4 = vld [vmem:[#allocation0] sm:$0x3]  }
   0xd   :  { %v7_v5 = vld [vmem:[#allocation0] sm:$0x3]  }
   0xe   :  { %9 = vst.msk [vmem:[%s119_s1] ss:$8 sm:$0x3] %vm8_vm0, %v7_v5   ;;  %17 = vrot.lane.b32.xlu0 %v16_v3, %s68_s11  ;;  %v34_v6 = vld [vmem:[#allocation0] sm:$0x3]  }
   0xf   :  { %29 = vrot.lane.b32.xlu1 %v28_v4, %s69_s12  ;;  %v40_v7 = vld [vmem:[#allocation0] sm:$0x3]  }
  0x10   :  { %v46_v8 = vld [vmem:[#allocation0] sm:$0x3]  }
  0x12   :  { %35 = vrot.lane.b32.xlu0 %v34_v6, %s70_s13 }
  0x13   :  { %41 = vrot.lane.b32.xlu1 %v40_v7, %s71_s14 }
  0x16   :  { %47 = vrot.lane.b32.xlu0 %v46_v8, %s72_s15 }
  0x7c   :  { %v12_v9 = vpop.permute.xlu0 %11  }
  0x7d   :  { %v24_v10 = vpop.permute.xlu1 %23   ;;  %52 = vst.msk [vmem:[%s119_s1 + $0x1] ss:$8 sm:$0x3] %vm8_vm0, %v12_v9  }
  0x7e   :  { %54 = vst.msk [vmem:[%s119_s1 + $0x3] ss:$8 sm:$0x3] %vm8_vm0, %v24_v10  }
  0x80   :  { %v18_v11 = vpop.permute.xlu0 %17  }
  0x81   :  { %v30_v12 = vpop.permute.xlu1 %29   ;;  %53 = vst.msk [vmem:[%s119_s1 + $0x2] ss:$8 sm:$0x3] %vm8_vm0, %v18_v11  }
  0x82   :  { %55 = vst.msk [vmem:[%s119_s1 + $0x4] ss:$8 sm:$0x3] %vm8_vm0, %v30_v12  }
  0x84   :  { %v36_v13 = vpop.permute.xlu0 %35  }
  0x85   :  { %v42_v14 = vpop.permute.xlu1 %41   ;;  %56 = vst.msk [vmem:[%s119_s1 + $0x5] ss:$8 sm:$0x3] %vm8_vm0, %v36_v13  }
  0x86   :  { %57 = vst.msk [vmem:[%s119_s1 + $0x6] ss:$8 sm:$0x3] %vm8_vm0, %v42_v14  }
  0x88   :  { %v48_v15 = vpop.permute.xlu0 %47  }
  0x89   :  { %58 = vst.msk [vmem:[%s119_s1 + $0x7] ss:$8 sm:$0x3] %vm8_vm0, %v48_v15  }

// kernel: bertmodel_forward.1
= control target key start
LH: loop header
LB: loop body
LE: loop exit
PB: predicated region body
PF: predicated region fallthrough
CT: control target
= control target key end

     0   :  { %s4819_s0 = inlined_call_operand.vmem [shape: s32[16,1], index: 0, kind: input, shape index: {}]   ;;  %s4820_s1 = inlined_call_operand.vmem [shape: s32[16,1], index: 1, kind: input, shape index: {}]   ;;  %s4821_s2 = inlined_call_operand.vmem [shape: s32[2,8], index: 2, kind: input, shape index: {}]   ;;  %s4822_s3 = inlined_call_operand.vmem [shape: f32[32,64], index: 3, kind: input, shape index: {}]   ;;  %s4823_s4 = inlined_call_operand.vmem [shape: f32[2,64], index: 4, kind: input, shape index: {}]   ;;  %s4824_s5 = inlined_call_operand.vmem [shape: f32[8,64], index: 5, kind: input, shape index: {}]   ;;  %s4825_s6 = inlined_call_operand.hbm [shape: f32[1,64], index: 6, kind: input, shape index: {}]   ;;  %s4826_s7 = inlined_call_operand.hbm [shape: f32[1,64], index: 7, kind: input, shape index: {}]   ;;  %s4827_s8 = inlined_call_operand.vmem [shape: bf16[2,64,192], index: 8, kind: input, shape index: {}]   ;;  %s4828_s9 = inlined_call_operand.vmem [shape: f32[2,1,192], index: 9, kind: input, shape index: {}]   ;;  %s4829_s10 = inlined_call_operand.vmem [shape: bf16[2,64,64], index: 10, kind: input, shape index: {}]   ;;  %s4830_s11 = inlined_call_operand.vmem [shape: f32[2,1,64], index: 11, kind: input, shape index: {}]   ;;  %s4831_s12 = inlined_call_operand.vmem [shape: f32[2,1,64], index: 12, kind: input, shape index: {}]   ;;  %s4832_s13 = inlined_call_operand.vmem [shape: f32[2,1,64], index: 13, kind: input, shape index: {}]   ;;  %s4833_s14 = inlined_call_operand.hbm [shape: bf16[2,64,128], index: 14, kind: input, shape index: {}]   ;;  %s4834_s15 = inlined_call_operand.vmem [shape: f32[2,1,128], index: 15, kind: input, shape index: {}]   ;;  %s4835_s16 = inlined_call_operand.vmem [shape: bf16[2,128,64], index: 16, kind: input, shape index: {}]   ;;  %s4836_s17 = inlined_call_operand.hbm [shape: f32[2,1,64], index: 17, kind: input, shape index: {}]   ;;  %s4837_s18 = inlined_call_operand.hbm [shape: f32[2,1,64], index: 18, kind: input, shape index: {}]   ;;  %s4838_s19 = inlined_call_operand.hbm [shape: f32[2,1,64], index: 19, kind: input, shape index: {}]   ;;  %s4839_s20 = inlined_call_operand.hbm [shape: bf16[64,64], index: 20, kind: input, shape index: {}]   ;;  %s4840_s21 = inlined_call_operand.hbm [shape: f32[1,64], index: 21, kind: input, shape index: {}]   ;;  %s4841_s22 = inlined_call_operand.vmem [shape: bf16[64,3], index: 22, kind: input, shape index: {}]   ;;  %s4842_s23 = inlined_call_operand.hbm [shape: f32[1,3], index: 23, kind: input, shape index: {}]   ;;  %s4843_s24 = inlined_call_operand.hbm [shape: f32[2,3], index: 24, kind: output, shape index: {}]  }
   0x1   :  { %4848 = sst [smem:[#allocation24_spill]] %s4819_s0 }
   0x2   :  { %4849 = sst [smem:[#allocation25_spill]] %s4820_s1 }
   0x3   :  { %4850 = sst [smem:[#allocation26_spill]] %s4821_s2 }
   0x4   :  { %4851 = sst [smem:[#allocation27_spill]] %s4822_s3 }
   0x5   :  { %4852 = sst [smem:[#allocation28_spill]] %s4823_s4 }
   0x6   :  { %4853 = sst [smem:[#allocation29_spill]] %s4824_s5 }
   0x7   :  { %4854 = sst [smem:[#allocation30_spill]] %s4825_s6 }
   0x8   :  { %4855 = sst [smem:[#allocation31_spill]] %s4826_s7 }
   0x9   :  { %4856 = sst [smem:[#allocation32_spill]] %s4827_s8 }
   0xa   :  { %29 = vsyncpa [#allocation3], 0 }
   0xb   :  { %30 = vsyncpa [#allocation6], 0 }
   0xc   :  { %31 = vsyncpa [#allocation9], 0 }
   0xd   :  { %32 = vsyncpa [#allocation12], 0 }
   0xe   :  { %33 = vsyncpa [#allocation15], 0 }
   0xf   :  { %34 = vsyncpa [#allocation4], 0  ;;  %s4117_s5 = smov [#allocation5]   ;;  %s4118_s27 = smov [#allocation8]  }
  0x10   :  { %s63_s26 = sshll.u32 %s4117_s5, 4  ;;  %s100_s28 = sshll.u32 %s4118_s27, 4  ;;  %s64_s26 = int_to_ptr.vmem [resolvable:$true] %s63_s26  ;;  %s101_s28 = int_to_ptr.vmem [resolvable:$true] %s100_s28 }
  0x11   :  { %s3913_s6 = scalar_lea.vmem %s64_s26, 16  ;;  %s3917_s2 = scalar_lea.vmem %s64_s26, 32 }
  0x12   :  { %p3914_p0 = scmp.ne.s32.totalorder %s64_s26, %s3913_s6  ;;  %p3918_p1 = scmp.lt.s32.totalorder %s64_s26, %s64_s26 }
  0x13   :  { %p3919_p2 = scmp.lt.s32.totalorder %s3917_s2, %s3913_s6 }
  0x15   :  { %p3920_p3 = por %p3919_p2, %p3918_p1 }
  0x17   :  { %p3921_p4 = pnand %p3920_p3, %p3914_p0 }
  0x19   :  { %3924 = shalt.err (!%p3921_p4)
}
  0x1a   :  { %s4857_s7 = sld [smem:[#allocation31_spill]]  ;;  %s3933_s30 = scalar_lea.vmem %s101_s28, 32 }
  0x1b   :  { %p3934_p5 = scmp.ne.s32.totalorder %s101_s28, %s3933_s30  ;;  %p3938_p6 = scmp.lt.s32.totalorder %s101_s28, %s101_s28 }
  0x1c   :  { %p3939_p7 = scmp.lt.s32.totalorder %s3933_s30, %s3933_s30 }
  0x1e   :  { %p3940_p8 = por %p3939_p7, %p3938_p6 }
  0x20   :  { %66 = dma.hbm_to_vmem [thread:$0]  %s4857_s7, 16, %s64_s26, [#allocation6]  }
  0x21   :  { %p3941_p9 = pnand %p3940_p8, %p3934_p5 }
  0x23   :  { %3944 = shalt.err (!%p3941_p9)
}
  0x24   :  { %s4119_s3 = smov 16   ;;  %s4120_s25 = smov 1  }
  0x25   :  { %106 = dma.hbm_to_vmem [thread:$0]  %s4836_s17, 32, %s101_s28, [#allocation9], %s4119_s3, %s4119_s3, %s4120_s25  }
  0x26   :  { %s4121_s1 = smov [#allocation11]   ;;  %s4122_s27 = smov [#allocation14]  }
  0x27   :  { %s124_s5 = sshll.u32 %s4121_s1, 4  ;;  %s149_s26 = sshll.u32 %s4122_s27, 4  ;;  %s125_s5 = int_to_ptr.vmem [resolvable:$true] %s124_s5  ;;  %s150_s26 = int_to_ptr.vmem [resolvable:$true] %s149_s26 }
  0x28   :  { %s3953_s6 = scalar_lea.vmem %s125_s5, 32  ;;  %p3958_p11 = scmp.lt.s32.totalorder %s125_s5, %s125_s5 }
  0x29   :  { %p3954_p10 = scmp.ne.s32.totalorder %s125_s5, %s3953_s6  ;;  %p3959_p12 = scmp.lt.s32.totalorder %s3953_s6, %s3953_s6 }
  0x2b   :  { %p3960_p13 = por %p3959_p12, %p3958_p11 }
  0x2d   :  { %p3961_p0 = pnand %p3960_p13, %p3954_p10 }
  0x2f   :  { %3964 = shalt.err (!%p3961_p0)
}
  0x30   :  { %130 = dma.hbm_to_vmem [thread:$0]  %s4838_s19, 32, %s125_s5, [#allocation12], %s4119_s3, %s4119_s3, %s4120_s25  }
  0x31   :  { %s3973_s17 = scalar_lea.vmem %s150_s26, 16  ;;  %s3977_s28 = scalar_lea.vmem %s150_s26, 32 }
  0x32   :  { %p3974_p1 = scmp.ne.s32.totalorder %s150_s26, %s3973_s17  ;;  %p3978_p2 = scmp.lt.s32.totalorder %s150_s26, %s150_s26 }
  0x33   :  { %p3979_p3 = scmp.lt.s32.totalorder %s3977_s28, %s3973_s17 }
  0x35   :  { %p3980_p4 = por %p3979_p3, %p3978_p2 }
  0x37   :  { %p3981_p5 = pnand %p3980_p4, %p3974_p1 }
  0x39   :  { %3984 = shalt.err (!%p3981_p5)
}
  0x3a   :  { %152 = dma.hbm_to_vmem [thread:$0]  %s4840_s21, 16, %s150_s26, [#allocation15]  }
  0x3b   :  { %s4123_s30 = smov [#allocation2]   ;;  %s4124_s4 = smov [#allocation7]  }
  0x3c   :  { %s53_s8 = sshll.u32 %s4123_s30, 4  ;;  %s84_s1 = sshll.u32 %s4124_s4, 4  ;;  %s54_s8 = int_to_ptr.vmem [resolvable:$true] %s53_s8  ;;  %s85_s1 = int_to_ptr.vmem [resolvable:$true] %s84_s1 }
  0x3d   :  { %s3993_s27 = scalar_lea.vmem %s54_s8, 16  ;;  %s3997_s19 = scalar_lea.vmem %s54_s8, 32 }
  0x3e   :  { %p3994_p6 = scmp.ne.s32.totalorder %s54_s8, %s3993_s27  ;;  %p3998_p7 = scmp.lt.s32.totalorder %s54_s8, %s54_s8 }
  0x3f   :  { %p3999_p8 = scmp.lt.s32.totalorder %s3997_s19, %s3993_s27 }
  0x41   :  { %p4000_p9 = por %p3999_p8, %p3998_p7 }
  0x43   :  { %p4001_p10 = pnand %p4000_p9, %p3994_p6 }
  0x45   :  { %4004 = shalt.err (!%p4001_p10)
}
  0x46   :  { %s4858_s2 = sld [smem:[#allocation30_spill]]  ;;  %s4013_s29 = scalar_lea.vmem %s85_s1, 1024 }
  0x47   :  { %p4014_p11 = scmp.ne.s32.totalorder %s85_s1, %s4013_s29  ;;  %p4018_p12 = scmp.lt.s32.totalorder %s85_s1, %s85_s1 }
  0x48   :  { %p4019_p13 = scmp.lt.s32.totalorder %s4013_s29, %s4013_s29 }
  0x4a   :  { %p4020_p0 = por %p4019_p13, %p4018_p12 }
  0x4c   :  { %56 = dma.hbm_to_vmem [thread:$0]  %s4858_s2, 16, %s54_s8, [#allocation3]  }
  0x4d   :  { %p4021_p1 = pnand %p4020_p0, %p4014_p11 }
  0x4f   :  { %4024 = shalt.err (!%p4021_p1)
}
  0x50   :  { %s4125_s21 = smov 64   ;;  %s4126_s26 = smov 4  }
  0x51   :  { %90 = dma.hbm_to_vmem [thread:$0]  %s4833_s14, 1024, %s85_s1, [#allocation6], %s4125_s21, %s4125_s21, %s4126_s26  }
  0x52   :  { %s4127_s0 = smov [#allocation10]   ;;  %s4128_s30 = smov [#allocation13]  }
  0x53   :  { %s112_s7 = sshll.u32 %s4127_s0, 4  ;;  %s136_s4 = sshll.u32 %s4128_s30, 4  ;;  %s113_s7 = int_to_ptr.vmem [resolvable:$true] %s112_s7  ;;  %s137_s4 = int_to_ptr.vmem [resolvable:$true] %s136_s4 }
  0x54   :  { %s4033_s8 = scalar_lea.vmem %s113_s7, 32  ;;  %p4038_p3 = scmp.lt.s32.totalorder %s113_s7, %s113_s7 }
  0x55   :  { %p4034_p2 = scmp.ne.s32.totalorder %s113_s7, %s4033_s8  ;;  %p4039_p4 = scmp.lt.s32.totalorder %s4033_s8, %s4033_s8 }
  0x57   :  { %p4040_p5 = por %p4039_p4, %p4038_p3 }
  0x59   :  { %p4041_p6 = pnand %p4040_p5, %p4034_p2 }
  0x5b   :  { %4044 = shalt.err (!%p4041_p6)
}
  0x5c   :  { %118 = dma.hbm_to_vmem [thread:$0]  %s4837_s18, 32, %s113_s7, [#allocation9], %s4119_s3, %s4119_s3, %s4120_s25  }
  0x5d   :  { %s4053_s14 = scalar_lea.vmem %s137_s4, 512  ;;  %p4058_p8 = scmp.lt.s32.totalorder %s137_s4, %s137_s4 }
  0x5e   :  { %p4054_p7 = scmp.ne.s32.totalorder %s137_s4, %s4053_s14  ;;  %p4059_p9 = scmp.lt.s32.totalorder %s4053_s14, %s4053_s14 }
  0x60   :  { %p4060_p10 = por %p4059_p9, %p4058_p8 }
  0x62   :  { %p4061_p11 = pnand %p4060_p10, %p4054_p7 }
  0x64   :  { %4064 = shalt.err (!%p4061_p11)
}
  0x65   :  { %142 = dma.hbm_to_vmem [thread:$0]  %s4839_s20, 512, %s137_s4, [#allocation12], %s4125_s21, %s4125_s21, %s4126_s26  }
  0x66   :  { %s4129_s6 = smov [#allocation16]  }
  0x67   :  { %s161_s2 = sshll.u32 %s4129_s6, 4  ;;  %s162_s2 = int_to_ptr.vmem [resolvable:$true] %s161_s2 }
  0x68   :  { %s4073_s29 = scalar_lea.vmem %s162_s2, 16  ;;  %s4077_s17 = scalar_lea.vmem %s162_s2, 32 }
  0x69   :  { %p4074_p12 = scmp.ne.s32.totalorder %s162_s2, %s4073_s29  ;;  %p4078_p13 = scmp.lt.s32.totalorder %s162_s2, %s162_s2 }
  0x6a   :  { %p4079_p0 = scmp.lt.s32.totalorder %s4077_s17, %s4073_s29 }
  0x6c   :  { %p4080_p1 = por %p4079_p0, %p4078_p13 }
  0x6e   :  { %p4081_p2 = pnand %p4080_p1, %p4074_p12 }
  0x70   :  { %4084 = shalt.err (!%p4081_p2)
}
  0x71   :  { %164 = dma.hbm_to_vmem [thread:$0]  %s4842_s23, 16, %s162_s2, [#allocation15]  }
  0x72   :  { %4105 = dma.done.wait [#allocation3], 16  }
  0x73   :  { %4106 = vsyncadd [#allocation3], 4294967280 }
  0x74   :  { %4107 = dma.done.wait [#allocation6], 1040  }
  0x75   :  { %4108 = vsyncadd [#allocation6], 4294966256 }
  0x76   :  { %4109 = dma.done.wait [#allocation9], 64  }
  0x77   :  { %4110 = vsyncadd [#allocation9], 4294967232 }
  0x78   :  { %4111 = dma.done.wait [#allocation12], 544  }
  0x79   :  { %4112 = vsyncadd [#allocation12], 4294966752 }
  0x7a   :  { %4113 = dma.done.wait [#allocation15], 32  }
  0x7b   :  { %4114 = vsyncadd [#allocation15], 4294967264  ;;  %v4130_v0 = vmov 0   ;;  %s4859_s26 = sld [smem:[#allocation24_spill]]  ;;  %vm235_vm0 = vcmask 1041408   ;;  %v4131_v10 = vmov 0.0   ;;  %v197_v11 = vlaneseq }
  0x7c   :  { %3778 = vset.pattern.permute.xlu1 %v4130_v0  ;;  %3777 = vset.pattern.permute.xlu0 %v4130_v0  ;;  %s4860_s30 = sld [smem:[#allocation25_spill]]  ;;  %vm315_vm1 = vcmask 261120   ;;  %vm228_vm4 = vcmask 15360   ;;  %vm401_vm7 = vcmask 523264   ;;  %v3258_v58 = vld [vmem:[#allocation2] ss:$0 sm:$0xff] }
  0x7d   :  { %s4861_s27 = sld [smem:[#allocation27_spill]]  ;;  %v198_v12 = vand.u32 127, %v197_v11  ;;  %v3259_v62 = vld [vmem:[#allocation5] ss:$0 sm:$0xff]  ;;  %vm4132_vm8 = vmmov 0   ;;  %vm647_vm9 = vcmask 64512  }
  0x7e   :  { %s4862_s18 = sld [smem:[#allocation28_spill]]  ;;  %vm3059_vm10 = vcmask 1040384   ;;  %vm3228_vm11 = vcmask 17408  }
  0x7f   :  { %s4863_s23 = sld [smem:[#allocation29_spill]] }
  0x80   :  { %s4864_s7 = sld [smem:[#allocation32_spill]] }
  0x81   :  { %v194_v1 = vld [vmem:[%s4859_s26 + $0x8] sm:$0xff]  ;;  %v193_v2 = vld [vmem:[%s4859_s26] sm:$0xff]  ;;  %s4133_s26 = smov 96   ;;  %s4865_s0 = sld [smem:[#allocation26_spill]] }
  0x82   :  { %203 = vperm.xlu1 %3778, %v194_v1   ;;  %200 = vperm.xlu0 %3777, %v193_v2   ;;  %v196_v3 = vld [vmem:[%s4860_s30 + $0x8] sm:$0xff]  ;;  %v195_v6 = vld [vmem:[%s4860_s30] sm:$0xff]  ;;  %s4134_s30 = smov 32  }
  0x83   :  { %v226_v4 = vld [vmem:[%s4861_s27 + $0x18] sm:$0xff]  ;;  %v225_v5 = vld [vmem:[%s4861_s27 + $0x10] sm:$0xff]  ;;  %v224_v7 = vld [vmem:[%s4861_s27 + $0x8] sm:$0xff] }
  0x84   :  { %3515 = vmatprep.subr.mxu1 %v226_v4  ;;  %v227_v8 = vld [vmem:[%s4862_s18] sm:$0x3] }
  0x85   :  { %3516 = vmatpush3.msra.mxu1 %v226_v4  ;;  %3510 = vmatprep.subr.msk.mxu0 %vm235_vm0, %v227_v8  ;;  %v223_v9 = vld [vmem:[%s4861_s27] sm:$0xff]  ;;  %v461_v4 = vshrl.u32 %v197_v11, 7 }
  0x86   :  { %3517 = vmatprep.subr.mxu1 %v225_v5  ;;  %3511 = vmatpush3.msk.msra.mxu0 %vm235_vm0, %v227_v8  ;;  %v314_v23 = vld [vmem:[%s4863_s23] sm:$0xff]  ;;  %v3781_v42 = vld [vmem:[%s4864_s7 + $0x34] ss:$8 sps:$4 sm:$0xff]   ;;  %v3779_v43 = vld [vmem:[%s4864_s7 + $0x30] ss:$8 sps:$4 sm:$0xff]  }
  0x87   :  { %215 = vperm.xlu1 %3778, %v196_v3   ;;  %212 = vperm.xlu0 %3777, %v195_v6   ;;  %v3784_v44 = vld [vmem:[%s4864_s7 + $0x24] ss:$8 sps:$4 sm:$0xff]   ;;  %v3782_v45 = vld [vmem:[%s4864_s7 + $0x20] ss:$8 sps:$4 sm:$0xff]   ;;  %v3787_v46 = vld [vmem:[%s4864_s7 + $0x14] ss:$8 sps:$4 sm:$0xff]  }
  0x88   :  { %3518 = vmatpush3.msra.mxu1 %v225_v5  ;;  %521 = vmatprep.subr.bf16.mxu0 %v3781_v42  ;;  %v3785_v47 = vld [vmem:[%s4864_s7 + $0x10] ss:$8 sps:$4 sm:$0xff]   ;;  %v3790_v48 = vld [vmem:[%s4864_s7 + $0x4] ss:$8 sps:$4 sm:$0xff]   ;;  %v3788_v49 = vld [vmem:[%s4864_s7] ss:$8 sps:$4 sm:$0xff]  }
  0x89   :  { %3519 = vmatprep.subr.mxu1 %v224_v7  ;;  %v4383_v5 = vsub.s32 0, %v461_v4  ;;  %v458_v6 = vld [vmem:[%s4828_s9] sm:$0x3]  ;;  %v4394_v11 = vsub.s32 1, %v461_v4 }
  0x8a   :  { %3520 = vmatpush3.msra.mxu1 %v224_v7 }
  0x8b   :  { %3521 = vmatprep.subr.mxu1 %v223_v9  ;;  %v4389_v7 = vrot.slane %v458_v6, %v4383_v5 }
  0x8c   :  { %3522 = vmatpush3.msra.mxu1 %v223_v9 }
  0x8d   :  { %3526 = vmatprep.subr.mxu1 %v4131_v10 }
  0xfd   :  { %v204_v13 = vpop.permute.xlu1 %203  ;;  %v201_v14 = vpop.permute.xlu0 %200 }
  0xfe   :  { %vm206_vm2 = vcmp.eq.s32.totalorder %v198_v12, %v204_v13  ;;  %vm205_vm3 = vcmp.eq.s32.totalorder %v198_v12, %v201_v14 }
  0xff   :  { %v3250_v15 = vsel %vm206_vm2, 1.0, %v4131_v10  ;;  %v3249_v16 = vsel %vm205_vm3, 1.0, %v4131_v10 }
 0x100   :  { %3523 = vmatprep.mubr.msk.f32.mxu1 %vm315_vm1, %v3249_v16  ;;  %v445_v16 = vld [vmem:[%s4865_s0] sm:$0x3] }
 0x101   :  { %3524 = vmatmul.mubr.msk.f32.vlgmr.msra.gmra.mxu1 %vm315_vm1, %v3250_v15 }
 0x102   :  { %v216_v17 = vpop.permute.xlu1 %215  ;;  %v213_v18 = vpop.permute.xlu0 %212  ;;  %3528 = vmatprep.mubr.msk.f32.mxu1 %vm4132_vm8, %v4131_v10 }
 0x103   :  { %vm218_vm5 = vcmp.eq.s32.totalorder %v198_v12, %v216_v17  ;;  %vm217_vm6 = vcmp.eq.s32.totalorder %v198_v12, %v213_v18  ;;  %v4397_v12 = vrot.slane %v458_v6, %v4394_v11  ;;  %v446_v17 = vcvt.s32.f32 %v445_v16 }
 0x104   :  { %v3252_v19 = vsel %vm218_vm5, 1.0, %v4131_v10  ;;  %v3251_v20 = vsel %vm217_vm6, 1.0, %v4131_v10 }
 0x105   :  { %3512 = vmatprep.mubr.msk.f32.mxu0 %vm228_vm4, %v3251_v20  ;;  %v447_v18 = vsub.f32 1.0, %v446_v17 }
 0x106   :  { %3513 = vmatmul.mubr.msk.f32.vlgmr.msra.gmra.mxu0 %vm228_vm4, %v3252_v19 }
 0x107   :  { %545 = vmatprep.mubr.bf16.mxu0 %v4130_v0  ;;  %522 = vmatpush1.bf16.msra.mxu0 %v3779_v43  ;;  %v4409_v19 = vmul.f32 -10000.0, %v447_v18 }
 0x108   :  { %523 = vmatprep.subr.bf16.mxu0 %v3784_v44 }
 0x109   :  { %v4413_v20 = vrot.slane %v4409_v19, %v4383_v5  ;;  %v4480_v16 = vrot.slane %v4409_v19, %v4394_v11 }
 0x10b   :  { %524 = vmatpush1.bf16.msra.mxu0 %v3782_v45 }
 0x10c   :  { %525 = vmatprep.subr.bf16.mxu0 %v3787_v46 }
 0x10f   :  { %526 = vmatpush1.bf16.msra.mxu0 %v3785_v47 }
 0x110   :  { %527 = vmatprep.subr.bf16.mxu0 %v3790_v48 }
 0x113   :  { %528 = vmatpush1.bf16.msra.mxu0 %v3788_v49 }
 0x114   :  { %3546 = vmatprep.subr.bf16.mxu0 %v4131_v10 }
 0x1c1   :  { %v3525_v21 = vpop.f32.mrf.mxu1 }
 0x1c3   :  { %v388_v25 = vpop.f32.mrf.mxu1 }
 0x1c6   :  { %v3514_v22 = vpop.f32.mrf.mxu0 }
 0x1c7   :  { %v394_v24 = vadd.f32 %v3525_v21, %v3514_v22 }
 0x1c8   :  { %v305_v26 = vpop.f32.mrf.mxu0 }
 0x1c9   :  { %v389_v27 = vadd.f32 %v388_v25, %v305_v26  ;;  %v398_v28 = vadd.f32 %v394_v24, %v314_v23 }
 0x1cb   :  { %v405_v29 = vsel %vm401_vm7, %v398_v28, 0.0  ;;  %v397_v30 = vadd.f32 %v389_v27, %v314_v23 }
 0x1cc   :  { %406 = vadd.xlane.f32.xlu1 %v405_v29 }
 0x1cd   :  { %v402_v31 = vsel %vm401_vm7, %v397_v30, 0.0 }
 0x1ce   :  { %403 = vadd.xlane.f32.xlu0 %v402_v31 }
 0x255   :  { %v407_v32 = vpop.xlane.xlu1 %406 }
 0x256   :  { %v410_v33 = vmul.f32 0.015625, %v407_v32 }
 0x257   :  { %v404_v34 = vpop.xlane.xlu0 %403 }
 0x258   :  { %v409_v35 = vmul.f32 0.015625, %v404_v34  ;;  %v412_v36 = vsub.f32 %v398_v28, %v410_v33 }
 0x25a   :  { %v411_v37 = vsub.f32 %v397_v30, %v409_v35  ;;  %v414_v40 = vmul.f32 %v412_v36, %v412_v36 }
 0x25c   :  { %v413_v38 = vmul.f32 %v411_v37, %v411_v37  ;;  %v418_v41 = vsel %vm401_vm7, %v414_v40, 0.0 }
 0x25e   :  { %v415_v39 = vsel %vm401_vm7, %v413_v38, 0.0 }
 0x25f   :  { %416 = vadd.xlane.f32.xlu0 %v415_v39 }
 0x263   :  { %419 = vadd.xlane.f32.xlu0 %v418_v41 }
 0x2e8   :  { %v417_v50 = vpop.xlane.xlu0 %416 }
 0x2e9   :  { %v421_v51 = vmul.f32 0.015625, %v417_v50 }
 0x2eb   :  { %v423_v52 = vadd.f32 1e-12, %v421_v51  ;;  %v3793_v51 = vld [vmem:[%s4829_s10 + $0x18] sm:$0xff]  }
 0x2ec   :  { %v420_v53 = vpop.xlane.xlu0 %419 }
 0x2ed   :  { %3843 = vrsqrt.f32 %v423_v52  ;;  %v422_v54 = vmul.f32 0.015625, %v420_v53  ;;  %v3794_v52 = vld [vmem:[%s4829_s10 + $0x10] sm:$0xff]  }
 0x2ef   :  { %v424_v55 = vadd.f32 1e-12, %v422_v54 }
 0x2f1   :  { %3845 = vrsqrt.f32 %v424_v55  ;;  %v4448_v55 = vld [vmem:[%s4829_s10 + $0x8] sm:$0xff]  }
 0x2fa   :  { %v3844_v56 = vpop.eup %3843 }
 0x2fb   :  { %v427_v57 = vmul.f32 %v3844_v56, %v411_v37 }
 0x2fd   :  { %v435_v61 = vmul.f32 %v3258_v58, %v427_v57  ;;  %v4455_v57 = vld [vmem:[%s4829_s10] sm:$0xff]  }
 0x2fe   :  { %v3846_v59 = vpop.eup %3845 }
 0x2ff   :  { %v428_v60 = vmul.f32 %v3846_v59, %v412_v36  ;;  %v4371_v1 = vadd.f32 %v3259_v62, %v435_v61 }
 0x301   :  { %v436_v63 = vmul.f32 %v3258_v58, %v428_v60 }
 0x303   :  { %v4373_v2 = vadd.f32 %v3259_v62, %v436_v63 }
 0x305   :  { %v449_v3 = vpack.c.bf16 %v4373_v2, %v4371_v1 }
 0x307   :  { %3268 = vmatmul.mubr.msk.bf16.vlgmr.msra.gmra.mxu0 %vm401_vm7, %v449_v3 }
 0x308   :  { %3550 = vmatprep.mubr.msk.bf16.mxu0 %vm4132_vm8, %v4131_v10  ;;  %3547 = vmatpush3.bf16.msra.mxu0 %v3793_v51 }
 0x309   :  { %3548 = vmatprep.subr.bf16.mxu0 %v4131_v10 }
 0x30c   :  { %3549 = vmatpush3.bf16.msra.mxu0 %v3794_v52 }
 0x30d   :  { %3562 = vmatprep.subr.mxu0 %v4131_v10 }
 0x3c7   :  { %v547_v8 = vpop.f32.mrf.mxu0 }
 0x3c8   :  { %v548_v9 = vadd.f32 %v547_v8, %v4389_v7 }
 0x3c9   :  { %v549_v13 = vpop.f32.mrf.mxu0 }
 0x3ca   :  { %565 = vrot.lane.b32.xlu1 %v548_v9, %s4125_s21  ;;  %v550_v15 = vadd.f32 %v549_v13, %v4397_v12 }
 0x3cb   :  { %v551_v49 = vpop.f32.mrf.mxu0 }
 0x3cc   :  { %v4433_v50 = vadd.f32 %v551_v49, %v4389_v7 }
 0x3cd   :  { %v553_v63 = vpop.f32.mrf.mxu0 }
 0x3ce   :  { %733 = vrot.lane.b32.xlu1 %v548_v9, %s4133_s26  ;;  %v554_v4 = vadd.f32 %v553_v63, %v4397_v12 }
 0x43c   :  { %v566_v14 = vpop.permute.xlu1 %565 }
 0x43d   :  { %3527 = vmatpush3.xpose.msk.msra.mxu1 %vm315_vm1, %v566_v14 }
 0x43e   :  { %3531 = vmatprep.subr.mxu1 %v4131_v10 }
 0x440   :  { %3529 = vmatmul.mubr.msk.f32.vlgmr.msra.gmra.mxu1 %vm315_vm1, %v548_v9  ;;  %v734_v35 = vpop.permute.xlu1 %733 }
 0x441   :  { %3532 = vmatpush3.msra.mxu1 %v550_v15  ;;  %3533 = vmatprep.mubr.msk.f32.mxu1 %vm4132_vm8, %v4131_v10 }
 0x442   :  { %3536 = vmatprep.subr.mxu1 %v4131_v10 }
 0x500   :  { %v637_v21 = vpop.f32.mrf.mxu1 }
 0x501   :  { %v641_v22 = vmul.f32 0.17677669, %v637_v21 }
 0x502   :  { %v3530_v23 = vpop.f32.mrf.mxu1 }
 0x503   :  { %v646_v24 = vadd.f32 %v4413_v20, %v641_v22 }
 0x505   :  { %v648_v25 = vsel %vm647_vm9, %v646_v24, -inf }
 0x506   :  { %649 = vmax.xlane.f32.xlu0 %v648_v25 }
 0x58f   :  { %v650_v26 = vpop.xlane.xlu0 %649 }
 0x590   :  { %v651_v27 = vsub.f32 %v646_v24, %v650_v26 }
 0x592   :  { %v652_v28 = vmul.f32 1.442695, %v651_v27 }
 0x594   :  { %3847 = vpow2.f32 %v652_v28 }
 0x5a1   :  { %v3848_v29 = vpop.eup %3847 }
 0x5a2   :  { %v654_v30 = vsel %vm647_vm9, %v3848_v29, 0.0 }
 0x5a3   :  { %655 = vadd.xlane.f32.xlu0 %v654_v30 }
 0x5b9   :  { %735 = vrot.lane.b32.xlu0 %v548_v9, %s4134_s30 }
 0x62c   :  { %v656_v31 = vpop.xlane.xlu0 %655 }
 0x62d   :  { %3849 = vrcp.f32 %v656_v31 }
 0x630   :  { %v736_v34 = vpop.permute.xlu0 %735 }
 0x63a   :  { %v3850_v32 = vpop.eup %3849 }
 0x63b   :  { %v658_v33 = vmul.f32 %v3850_v32, %v3848_v29 }
 0x63d   :  { %3534 = vmatmul.mubr.msk.f32.vlgmr.msra.gmra.mxu1 %vm647_vm9, %v658_v33 }
 0x63e   :  { %3537 = vmatpush3.xpose.msk.msra.mxu1 %vm315_vm1, %v736_v34  ;;  %3538 = vmatprep.mubr.msk.f32.mxu1 %vm4132_vm8, %v4131_v10 }
 0x63f   :  { %3541 = vmatprep.subr.mxu1 %v4131_v10 }
 0x641   :  { %3539 = vmatmul.mubr.msk.f32.vlgmr.msra.gmra.mxu1 %vm315_vm1, %v734_v35 }
 0x642   :  { %3543 = vmatprep.mubr.msk.f32.mxu1 %vm4132_vm8, %v4131_v10 }
 0x6fd   :  { %v728_v36 = vpop.f32.mrf.mxu1 }
 0x6fe   :  { %v732_v58 = vpack.c.bf16 %v728_v36, %v728_v36 }
 0x6ff   :  { %v3535_v37 = vpop.f32.mrf.mxu1 }
 0x701   :  { %v807_v38 = vpop.f32.mrf.mxu1 }
 0x702   :  { %v811_v39 = vmul.f32 0.17677669, %v807_v38 }
 0x703   :  { %v3540_v40 = vpop.f32.mrf.mxu1 }
 0x704   :  { %v812_v41 = vadd.f32 %v811_v39, %v4413_v20 }
 0x706   :  { %v813_v42 = vsel %vm647_vm9, %v812_v41, -inf }
 0x707   :  { %814 = vmax.xlane.f32.xlu1 %v813_v42 }
 0x718   :  { %825 = vrot.lane.b32.xlu1 %v550_v15, %s4133_s26 }
 0x790   :  { %v815_v43 = vpop.xlane.xlu1 %814 }
 0x791   :  { %v816_v44 = vsub.f32 %v812_v41, %v815_v43 }
 0x793   :  { %v817_v45 = vmul.f32 1.442695, %v816_v44  ;;  %v3289_v44 = vld [vmem:[%s4830_s11] ss:$0 sm:$0xff] }
 0x794   :  { %v826_v46 = vpop.permute.xlu1 %825 }
 0x795   :  { %3851 = vpow2.f32 %v817_v45  ;;  %3542 = vmatpush3.msra.mxu1 %v826_v46 }
 0x796   :  { %3554 = vmatprep.subr.bf16.mxu1 %v4131_v10 }
 0x7a2   :  { %v3852_v47 = vpop.eup %3851 }
 0x7a3   :  { %v819_v48 = vsel %vm647_vm9, %v3852_v47, 0.0 }
 0x7a4   :  { %820 = vadd.xlane.f32.xlu0 %v819_v48 }
 0x7ba   :  { %1013 = vrot.lane.b32.xlu0 %v4433_v50, %s4125_s21 }
 0x82d   :  { %v821_v53 = vpop.xlane.xlu0 %820 }
 0x82e   :  { %3853 = vrcp.f32 %v821_v53 }
 0x831   :  { %v1014_v62 = vpop.permute.xlu0 %1013 }
 0x83b   :  { %v3854_v54 = vpop.eup %3853 }
 0x83c   :  { %v823_v56 = vmul.f32 %v3854_v54, %v3852_v47 }
 0x83e   :  { %3544 = vmatmul.mubr.msk.f32.vlgmr.msra.gmra.mxu1 %vm647_vm9, %v823_v56 }
 0x83f   :  { %3555 = vmatpush3.bf16.msra.mxu1 %v4448_v55  ;;  %3558 = vmatprep.mubr.msk.bf16.mxu1 %vm4132_vm8, %v4131_v10 }
 0x840   :  { %3556 = vmatprep.subr.bf16.mxu1 %v4131_v10 }
 0x843   :  { %3557 = vmatpush3.bf16.msra.mxu1 %v4455_v57 }
 0x844   :  { %3582 = vmatprep.subr.bf16.mxu1 %v4131_v10 }
 0x846   :  { %3559 = vmatmul.mubr.msk.bf16.vlgmr.msra.gmra.mxu1 %vm315_vm1, %v732_v58 }
 0x847   :  { %3583 = vmatpush3.bf16.msra.mxu1 %v3793_v51  ;;  %3586 = vmatprep.mubr.msk.bf16.mxu1 %vm4132_vm8, %v4131_v10 }
 0x848   :  { %3584 = vmatprep.subr.bf16.mxu1 %v4131_v10 }
 0x84b   :  { %3585 = vmatpush3.bf16.msra.mxu1 %v3794_v52 }
 0x84c   :  { %3598 = vmatprep.subr.bf16.mxu1 %v4131_v10 }
 0x8fe   :  { %v897_v59 = vpop.f32.mrf.mxu1 }
 0x8ff   :  { %v901_v60 = vpack.c.bf16 %v897_v59, %v897_v59 }
 0x900   :  { %v3545_v61 = vpop.f32.mrf.mxu1 }
 0x901   :  { %3551 = vmatmul.mubr.msk.bf16.vlgmr.msra.gmra.mxu0 %vm315_vm1, %v901_v60 }
 0x902   :  { %3563 = vmatpush3.xpose.msk.msra.mxu0 %vm315_vm1, %v1014_v62  ;;  %3564 = vmatprep.mubr.msk.f32.mxu0 %vm4132_vm8, %v4131_v10 }
 0x903   :  { %3567 = vmatprep.subr.mxu0 %v4131_v10 }
 0x906   :  { %v1006_v3 = vpop.f32.mrf.mxu1 }
 0x908   :  { %v3560_v6 = vpop.f32.mrf.mxu1 }
 0x909   :  { %3565 = vmatmul.mubr.msk.f32.vlgmr.msra.gmra.mxu0 %vm315_vm1, %v4433_v50 }
 0x90a   :  { %v1009_v7 = vpop.f32.mrf.mxu1  ;;  %3568 = vmatpush3.msra.mxu0 %v554_v4  ;;  %3569 = vmatprep.mubr.msk.f32.mxu0 %vm4132_vm8, %v4131_v10 }
 0x90b   :  { %3572 = vmatprep.subr.mxu0 %v4131_v10 }
 0x90c   :  { %v3561_v8 = vpop.f32.mrf.mxu1 }
 0x9c1   :  { %v951_v9 = vpop.f32.mrf.mxu0 }
 0x9c2   :  { %v1007_v43 = vadd.f32 %v1006_v3, %v951_v9 }
 0x9c3   :  { %v3552_v13 = vpop.f32.mrf.mxu0 }
 0x9c4   :  { %v1442_v45 = vadd.f32 %v3289_v44, %v1007_v43  ;;  %v3800_v43 = vld [vmem:[%s4835_s16 + $0x30] sm:$0xff]  }
 0x9c5   :  { %v954_v14 = vpop.f32.mrf.mxu0 }
 0x9c6   :  { %v1444_v48 = vadd.f32 %v1442_v45, %v4371_v1  ;;  %v3803_v45 = vld [vmem:[%s4835_s16 + $0x18] sm:$0xff]  }
 0x9c7   :  { %v3553_v15 = vpop.f32.mrf.mxu0 }
 0x9c8   :  { %v1448_v49 = vsel %vm401_vm7, %v1444_v48, 0.0 }
 0x9c9   :  { %v1085_v12 = vpop.f32.mrf.mxu0 }
 0x9ca   :  { %v1089_v17 = vmul.f32 0.17677669, %v1085_v12 }
 0x9cb   :  { %v3566_v18 = vpop.f32.mrf.mxu0 }
 0x9cc   :  { %v1094_v21 = vadd.f32 %v4480_v16, %v1089_v17 }
 0x9ce   :  { %v1095_v22 = vsel %vm647_vm9, %v1094_v21, -inf }
 0x9cf   :  { %1096 = vmax.xlane.f32.xlu1 %v1095_v22 }
 0x9e0   :  { %1182 = vrot.lane.b32.xlu1 %v4433_v50, %s4134_s30 }
 0xa58   :  { %v1097_v23 = vpop.xlane.xlu1 %1096 }
 0xa59   :  { %v1098_v24 = vsub.f32 %v1094_v21, %v1097_v23  ;;  %v3795_v23 = vld [vmem:[#allocation7 + $0x18] sm:$0xff]  }
 0xa5b   :  { %v1099_v25 = vmul.f32 1.442695, %v1098_v24  ;;  %v3797_v24 = vld [vmem:[#allocation7 + $0x8] sm:$0xff]  }
 0xa5c   :  { %v1183_v30 = vpop.permute.xlu1 %1182 }
 0xa5d   :  { %3855 = vpow2.f32 %v1099_v25  ;;  %v3798_v25 = vld [vmem:[#allocation7] sm:$0xff]  }
 0xa6a   :  { %v3856_v26 = vpop.eup %3855 }
 0xa6b   :  { %v1101_v27 = vsel %vm647_vm9, %v3856_v26, 0.0 }
 0xa6c   :  { %1102 = vadd.xlane.f32.xlu0 %v1101_v27 }
 0xa82   :  { %1180 = vrot.lane.b32.xlu0 %v4433_v50, %s4133_s26 }
 0xaf5   :  { %v1103_v19 = vpop.xlane.xlu0 %1102 }
 0xaf6   :  { %3857 = vrcp.f32 %v1103_v19 }
 0xaf9   :  { %v1181_v31 = vpop.permute.xlu0 %1180 }
 0xb03   :  { %v3858_v28 = vpop.eup %3857 }
 0xb04   :  { %v1105_v29 = vmul.f32 %v3858_v28, %v3856_v26 }
 0xb06   :  { %3570 = vmatmul.mubr.msk.f32.vlgmr.msra.gmra.mxu0 %vm647_vm9, %v1105_v29 }
 0xb07   :  { %3573 = vmatpush3.xpose.msk.msra.mxu0 %vm315_vm1, %v1183_v30  ;;  %3574 = vmatprep.mubr.msk.f32.mxu0 %vm4132_vm8, %v4131_v10 }
 0xb08   :  { %3577 = vmatprep.subr.mxu0 %v4131_v10 }
 0xb0a   :  { %3575 = vmatmul.mubr.msk.f32.vlgmr.msra.gmra.mxu0 %vm315_vm1, %v1181_v31 }
 0xb0b   :  { %3579 = vmatprep.mubr.msk.f32.mxu0 %vm4132_vm8, %v4131_v10 }
 0xbc6   :  { %v1175_v32 = vpop.f32.mrf.mxu0 }
 0xbc7   :  { %v1179_v1 = vpack.c.bf16 %v1175_v32, %v1175_v32 }
 0xbc8   :  { %v3571_v33 = vpop.f32.mrf.mxu0 }
 0xbc9   :  { %v3290_v33 = vld [vmem:[%s4831_s12] ss:$0 sm:$0xff] }
 0xbca   :  { %v1254_v34 = vpop.f32.mrf.mxu0 }
 0xbcb   :  { %v1258_v35 = vmul.f32 0.17677669, %v1254_v34 }
 0xbcc   :  { %v3576_v36 = vpop.f32.mrf.mxu0 }
 0xbcd   :  { %v1259_v37 = vadd.f32 %v1258_v35, %v4480_v16 }
 0xbcf   :  { %v1260_v38 = vsel %vm647_vm9, %v1259_v37, -inf }
 0xbd0   :  { %1261 = vmax.xlane.f32.xlu1 %v1260_v38 }
 0xbe1   :  { %1272 = vrot.lane.b32.xlu1 %v554_v4, %s4133_s26 }
 0xc59   :  { %v1262_v39 = vpop.xlane.xlu1 %1261 }
 0xc5a   :  { %v1263_v40 = vsub.f32 %v1259_v37, %v1262_v39  ;;  %v3291_v37 = vld [vmem:[%s4832_s13] ss:$0 sm:$0xff] }
 0xc5c   :  { %v1264_v41 = vmul.f32 1.442695, %v1263_v40 }
 0xc5d   :  { %v1273_v42 = vpop.permute.xlu1 %1272 }
 0xc5e   :  { %3859 = vpow2.f32 %v1264_v41  ;;  %3578 = vmatpush3.msra.mxu0 %v1273_v42  ;;  %v3799_v42 = vld [vmem:[%s4835_s16 + $0x38] sm:$0xff]  }
 0xc5f   :  { %3590 = vmatprep.subr.bf16.mxu0 %v4131_v10 }
 0xc6b   :  { %v3860_v46 = vpop.eup %3859 }
 0xc6c   :  { %v1266_v47 = vsel %vm647_vm9, %v3860_v46, 0.0 }
 0xc6d   :  { %1267 = vadd.xlane.f32.xlu0 %v1266_v47  ;;  %v3805_v47 = vld [vmem:[%s4835_s16 + $0x8] sm:$0xff]  }
 0xc71   :  { %1449 = vadd.xlane.f32.xlu0 %v1448_v49  ;;  %v3292_v49 = vld [vmem:[%s4834_s15] ss:$0 sm:$0xff] }
 0xcf6   :  { %v1268_v50 = vpop.xlane.xlu0 %1267 }
 0xcf7   :  { %3861 = vrcp.f32 %v1268_v50 }
 0xcfa   :  { %v1450_v60 = vpop.xlane.xlu0 %1449 }
 0xcfb   :  { %v1454_v61 = vmul.f32 0.015625, %v1450_v60 }
 0xcfd   :  { %v1456_v4 = vsub.f32 %v1444_v48, %v1454_v61  ;;  %v3806_v48 = vld [vmem:[%s4835_s16] sm:$0xff]  }
 0xcff   :  { %v1458_v14 = vmul.f32 %v1456_v4, %v1456_v4 }
 0xd01   :  { %v1460_v15 = vsel %vm401_vm7, %v1458_v14, 0.0 }
 0xd04   :  { %v3862_v51 = vpop.eup %3861 }
 0xd05   :  { %v1270_v52 = vmul.f32 %v3862_v51, %v3860_v46  ;;  %v3804_v46 = vld [vmem:[%s4835_s16 + $0x10] sm:$0xff]  }
 0xd07   :  { %3580 = vmatmul.mubr.msk.f32.vlgmr.msra.gmra.mxu0 %vm647_vm9, %v1270_v52 }
 0xd08   :  { %3591 = vmatpush3.bf16.msra.mxu0 %v4448_v55  ;;  %3594 = vmatprep.mubr.msk.bf16.mxu0 %vm4132_vm8, %v4131_v10 }
 0xd09   :  { %3592 = vmatprep.subr.bf16.mxu0 %v4131_v10 }
 0xd0c   :  { %3593 = vmatpush3.bf16.msra.mxu0 %v4455_v57 }
 0xd0d   :  { %3610 = vmatprep.subr.bf16.mxu0 %v4131_v10 }
 0xd0f   :  { %3595 = vmatmul.mubr.msk.bf16.vlgmr.msra.gmra.mxu0 %vm315_vm1, %v1179_v1 }
 0xd10   :  { %3626 = vmatprep.mubr.msk.bf16.mxu0 %vm4132_vm8, %v4131_v10  ;;  %3611 = vmatpush3.bf16.msra.mxu0 %v3799_v42  ;;  %v3815_v42 = vld [vmem:[%s4864_s7 + $0x54] ss:$8 sps:$4 sm:$0xff]  }
 0xd11   :  { %3612 = vmatprep.subr.bf16.mxu0 %v4131_v10 }
 0xd14   :  { %3613 = vmatpush3.bf16.msra.mxu0 %v3800_v43  ;;  %v3813_v43 = vld [vmem:[%s4864_s7 + $0x50] ss:$8 sps:$4 sm:$0xff]  }
 0xd15   :  { %3614 = vmatprep.subr.bf16.mxu0 %v4131_v10 }
 0xdc7   :  { %v1344_v53 = vpop.f32.mrf.mxu0 }
 0xdc8   :  { %v1348_v54 = vpack.c.bf16 %v1344_v53, %v1344_v53 }
 0xdc9   :  { %v3581_v56 = vpop.f32.mrf.mxu0 }
 0xdca   :  { %3587 = vmatmul.mubr.msk.bf16.vlgmr.msra.gmra.mxu1 %vm315_vm1, %v1348_v54 }
 0xdcb   :  { %3606 = vmatprep.mubr.msk.bf16.mxu1 %vm4132_vm8, %v4131_v10  ;;  %3599 = vmatpush3.bf16.msra.mxu1 %v3795_v23 }
 0xdcc   :  { %3600 = vmatprep.subr.bf16.mxu1 %v4131_v10 }
 0xdcf   :  { %v1429_v55 = vpop.f32.mrf.mxu0 }
 0xdd1   :  { %v3596_v58 = vpop.f32.mrf.mxu0 }
 0xdd3   :  { %v1432_v59 = vpop.f32.mrf.mxu0 }
 0xdd5   :  { %v3597_v57 = vpop.f32.mrf.mxu0 }
 0xe8a   :  { %v1386_v62 = vpop.f32.mrf.mxu1 }
 0xe8b   :  { %v1430_v63 = vadd.f32 %v1429_v55, %v1386_v62 }
 0xe8c   :  { %v3588_v3 = vpop.f32.mrf.mxu1 }
 0xe8d   :  { %v1443_v6 = vadd.f32 %v3289_v44, %v1430_v63  ;;  %v3801_v44 = vld [vmem:[%s4835_s16 + $0x28] sm:$0xff]  }
 0xe8e   :  { %v1389_v7 = vpop.f32.mrf.mxu1  ;;  %3615 = vmatpush3.bf16.msra.mxu0 %v3801_v44  ;;  %v3818_v44 = vld [vmem:[%s4864_s7 + $0x44] ss:$8 sps:$4 sm:$0xff]  }
 0xe8f   :  { %v1445_v8 = vadd.f32 %v1443_v6, %v4373_v2  ;;  %v3796_v2 = vld [vmem:[#allocation7 + $0x10] sm:$0xff]   ;;  %3616 = vmatprep.subr.bf16.mxu0 %v4131_v10 }
 0xe90   :  { %v3589_v9 = vpop.f32.mrf.mxu1  ;;  %3601 = vmatpush3.bf16.msra.mxu1 %v3796_v2 }
 0xe91   :  { %v1451_v13 = vsel %vm401_vm7, %v1445_v8, 0.0  ;;  %3602 = vmatprep.subr.bf16.mxu1 %v4131_v10 }
 0xe92   :  { %1452 = vadd.xlane.f32.xlu0 %v1451_v13 }
 0xe94   :  { %3603 = vmatpush3.bf16.msra.mxu1 %v3797_v24 }
 0xe95   :  { %3604 = vmatprep.subr.bf16.mxu1 %v4131_v10 }
 0xe96   :  { %1461 = vadd.xlane.f32.xlu0 %v1460_v15 }
 0xe98   :  { %3605 = vmatpush3.bf16.msra.mxu1 %v3798_v25 }
 0xf1b   :  { %v1453_v12 = vpop.xlane.xlu0 %1452 }
 0xf1c   :  { %v1455_v17 = vmul.f32 0.015625, %v1453_v12 }
 0xf1e   :  { %v1457_v18 = vsub.f32 %v1445_v8, %v1455_v17  ;;  %v3298_v17 = vld [vmem:[#allocation8] ss:$0 sm:$0xff] }
 0xf1f   :  { %v1462_v26 = vpop.xlane.xlu0 %1461 }
 0xf20   :  { %v1459_v21 = vmul.f32 %v1457_v18, %v1457_v18  ;;  %v1466_v27 = vmul.f32 0.015625, %v1462_v26 }
 0xf22   :  { %v1463_v22 = vsel %vm401_vm7, %v1459_v21, 0.0  ;;  %v1468_v19 = vadd.f32 1e-12, %v1466_v27 }
 0xf23   :  { %1464 = vadd.xlane.f32.xlu1 %v1463_v22 }
 0xf24   :  { %3863 = vrsqrt.f32 %v1468_v19 }
 0xf31   :  { %v3864_v31 = vpop.eup %3863 }
 0xf32   :  { %v1472_v32 = vmul.f32 %v3864_v31, %v1456_v4 }
 0xf34   :  { %v1480_v36 = vmul.f32 %v3290_v33, %v1472_v32 }
 0xf36   :  { %v4533_v39 = vadd.f32 %v3291_v37, %v1480_v36 }
 0xfac   :  { %v1465_v28 = vpop.xlane.xlu1 %1464 }
 0xfad   :  { %v1467_v29 = vmul.f32 0.015625, %v1465_v28 }
 0xfaf   :  { %v1469_v30 = vadd.f32 1e-12, %v1467_v29 }
 0xfb1   :  { %3865 = vrsqrt.f32 %v1469_v30 }
 0xfbe   :  { %v3866_v34 = vpop.eup %3865 }
 0xfbf   :  { %v1473_v35 = vmul.f32 %v3866_v34, %v1457_v18 }
 0xfc1   :  { %v1481_v38 = vmul.f32 %v3290_v33, %v1473_v35 }
 0xfc3   :  { %v4535_v40 = vadd.f32 %v3291_v37, %v1481_v38  ;;  %v3809_v38 = vld [vmem:[%s4864_s7 + $0x74] ss:$8 sps:$4 sm:$0xff]  }
 0xfc4   :  { %1825 = vmatprep.subr.bf16.mxu1 %v3809_v38 }
 0xfc5   :  { %v1490_v41 = vpack.c.bf16 %v4535_v40, %v4533_v39 }
 0xfc7   :  { %3607 = vmatmul.mubr.msk.bf16.vlgmr.msra.gmra.mxu1 %vm401_vm7, %v1490_v41  ;;  %v3810_v41 = vld [vmem:[%s4864_s7 + $0x60] ss:$8 sps:$4 sm:$0xff]  }
 0xfc8   :  { %1849 = vmatprep.mubr.bf16.mxu1 %v4130_v0  ;;  %v3802_v0 = vld [vmem:[%s4835_s16 + $0x20] sm:$0xff]  }
 0xfc9   :  { %3617 = vmatpush3.bf16.msra.mxu0 %v3802_v0  ;;  %v3816_v0 = vld [vmem:[%s4864_s7 + $0x40] ss:$8 sps:$4 sm:$0xff]  }
 0xfca   :  { %3618 = vmatprep.subr.bf16.mxu0 %v4131_v10 }
 0xfcd   :  { %3619 = vmatpush3.bf16.msra.mxu0 %v3803_v45 }
 0xfce   :  { %3620 = vmatprep.subr.bf16.mxu0 %v4131_v10 }
 0xfd1   :  { %3621 = vmatpush3.bf16.msra.mxu0 %v3804_v46 }
 0xfd2   :  { %3622 = vmatprep.subr.bf16.mxu0 %v4131_v10 }
 0xfd5   :  { %3623 = vmatpush3.bf16.msra.mxu0 %v3805_v47 }
 0xfd6   :  { %3624 = vmatprep.subr.bf16.mxu0 %v4131_v10 }
 0xfd9   :  { %3625 = vmatpush3.bf16.msra.mxu0 %v3806_v48 }
 0xfda   :  { %3635 = vmatprep.subr.mxu0 %v4131_v10 }
0x1087   :  { %v1567_v50 = vpop.f32.mrf.mxu1 }
0x1088   :  { %v1568_v51 = vadd.f32 %v3292_v49, %v1567_v50 }
0x1089   :  { %v3608_v52 = vpop.f32.mrf.mxu1 }
0x108a   :  { %v1574_v1 = vmul.f32 %v1568_v51, %v1568_v51 }
0x108b   :  { %v1570_v53 = vpop.f32.mrf.mxu1 }
0x108c   :  { %v1576_v54 = vmul.f32 %v1574_v1, %v1568_v51  ;;  %v1571_v56 = vadd.f32 %v3292_v49, %v1570_v53  ;;  %v3307_v1 = vld [vmem:[#allocation10] ss:$0 sm:$0xff] }
0x108d   :  { %v3609_v55 = vpop.f32.mrf.mxu1 }
0x108e   :  { %v1578_v58 = vmul.f32 0.044715, %v1576_v54  ;;  %v1575_v59 = vmul.f32 %v1571_v56, %v1571_v56  ;;  %v3308_v55 = vld [vmem:[#allocation11] ss:$0 sm:$0xff] }
0x1090   :  { %v1580_v57 = vadd.f32 %v1578_v58, %v1568_v51  ;;  %v1577_v60 = vmul.f32 %v1575_v59, %v1571_v56 }
0x1092   :  { %v1582_v61 = vmul.f32 0.7978846, %v1580_v57  ;;  %v1579_v62 = vmul.f32 0.044715, %v1577_v60 }
0x1094   :  { %3867 = vtanh.f32 %v1582_v61  ;;  %v1581_v63 = vadd.f32 %v1579_v62, %v1571_v56  ;;  %v3317_v61 = vld [vmem:[%s4828_s9 + $0x2] sm:$0x3] }
0x1095   :  { %v1767_v62 = vrot.slane %v3317_v61, %v4383_v5 }
0x1096   :  { %v1583_v3 = vmul.f32 0.7978846, %v1581_v63  ;;  %v4623_v63 = vrot.slane %v3317_v61, %v4394_v11 }
0x1098   :  { %3869 = vtanh.f32 %v1583_v3 }
0x10a1   :  { %v3868_v4 = vpop.eup %3867 }
0x10a2   :  { %v1586_v6 = vadd.f32 1.0, %v3868_v4 }
0x10a4   :  { %v1588_v8 = vmul.f32 0.5, %v1586_v6 }
0x10a5   :  { %v3870_v7 = vpop.eup %3869 }
0x10a6   :  { %v1587_v9 = vadd.f32 1.0, %v3870_v7  ;;  %v1590_v14 = vmul.f32 %v1588_v8, %v1568_v51 }
0x10a8   :  { %v1589_v13 = vmul.f32 0.5, %v1587_v9 }
0x10aa   :  { %v1591_v15 = vmul.f32 %v1589_v13, %v1571_v56 }
0x10ac   :  { %v1592_v12 = vpack.c.bf16 %v1591_v15, %v1590_v14 }
0x10ae   :  { %3627 = vmatmul.mubr.bf16.vlgmr.msra.gmra.mxu0 %v1592_v12 }
0x10af   :  { %3637 = vmatprep.mubr.msk.f32.mxu0 %vm4132_vm8, %v4131_v10 }
0x116e   :  { %v1698_v18 = vpop.f32.mrf.mxu0 }
0x116f   :  { %v1699_v21 = vadd.f32 %v3298_v17, %v1698_v18 }
0x1170   :  { %v3628_v22 = vpop.f32.mrf.mxu0 }
0x1171   :  { %v1705_v23 = vadd.f32 %v1699_v21, %v4533_v39  ;;  %v3807_v39 = vld [vmem:[%s4864_s7 + $0x70] ss:$8 sps:$4 sm:$0xff]  }
0x1172   :  { %v1701_v2 = vpop.f32.mrf.mxu0  ;;  %1826 = vmatpush1.bf16.msra.mxu1 %v3807_v39 }
0x1173   :  { %v1702_v24 = vadd.f32 %v3298_v17, %v1701_v2  ;;  %v1709_v25 = vsel %vm401_vm7, %v1705_v23, 0.0 }
0x1174   :  { %1710 = vadd.xlane.f32.xlu0 %v1709_v25  ;;  %v3629_v26 = vpop.f32.mrf.mxu0 }
0x1175   :  { %v1706_v27 = vadd.f32 %v1702_v24, %v4535_v40  ;;  %v3812_v40 = vld [vmem:[%s4864_s7 + $0x64] ss:$8 sps:$4 sm:$0xff]  }
0x1176   :  { %1827 = vmatprep.subr.bf16.mxu1 %v3812_v40 }
0x1177   :  { %v1712_v19 = vsel %vm401_vm7, %v1706_v27, 0.0  ;;  %1828 = vmatpush1.bf16.msra.mxu1 %v3810_v41  ;;  %v4665_v41 = vld [vmem:[%s4829_s10 + $0x28] sm:$0xff]  }
0x1178   :  { %1713 = vadd.xlane.f32.xlu0 %v1712_v19  ;;  %1829 = vmatprep.subr.bf16.mxu1 %v3815_v42 }
0x117b   :  { %1830 = vmatpush1.bf16.msra.mxu1 %v3813_v43  ;;  %v4673_v43 = vld [vmem:[%s4829_s10 + $0x20] sm:$0xff]  }
0x117c   :  { %1831 = vmatprep.subr.bf16.mxu1 %v3818_v44  ;;  %v3822_v44 = vld [vmem:[%s4829_s10 + $0x30] sm:$0xff]  }
0x117f   :  { %1832 = vmatpush1.bf16.msra.mxu1 %v3816_v0 }
0x1180   :  { %3630 = vmatprep.subr.mxu1 %v4131_v10 }
0x11fd   :  { %v1711_v28 = vpop.xlane.xlu0 %1710 }
0x11fe   :  { %v1715_v29 = vmul.f32 0.015625, %v1711_v28 }
0x1200   :  { %v1717_v30 = vsub.f32 %v1705_v23, %v1715_v29 }
0x1201   :  { %v1714_v31 = vpop.xlane.xlu0 %1713 }
0x1202   :  { %v1716_v32 = vmul.f32 0.015625, %v1714_v31  ;;  %v1719_v33 = vmul.f32 %v1717_v30, %v1717_v30 }
0x1204   :  { %v1718_v34 = vsub.f32 %v1706_v27, %v1716_v32  ;;  %v1721_v35 = vsel %vm401_vm7, %v1719_v33, 0.0 }
0x1205   :  { %1722 = vadd.xlane.f32.xlu0 %v1721_v35 }
0x1206   :  { %v1720_v36 = vmul.f32 %v1718_v34, %v1718_v34 }
0x1208   :  { %v1724_v37 = vsel %vm401_vm7, %v1720_v36, 0.0 }
0x1209   :  { %1725 = vadd.xlane.f32.xlu0 %v1724_v37 }
0x128e   :  { %v1723_v45 = vpop.xlane.xlu0 %1722 }
0x128f   :  { %v1727_v46 = vmul.f32 0.015625, %v1723_v45 }
0x1291   :  { %v1729_v47 = vadd.f32 1e-12, %v1727_v46 }
0x1292   :  { %v1726_v48 = vpop.xlane.xlu0 %1725 }
0x1293   :  { %3871 = vrsqrt.f32 %v1729_v47  ;;  %v1728_v49 = vmul.f32 0.015625, %v1726_v48 }
0x1295   :  { %v1730_v50 = vadd.f32 1e-12, %v1728_v49 }
0x1297   :  { %3873 = vrsqrt.f32 %v1730_v50 }
0x12a0   :  { %v3872_v51 = vpop.eup %3871 }
0x12a1   :  { %v1733_v52 = vmul.f32 %v3872_v51, %v1717_v30 }
0x12a3   :  { %v1741_v56 = vmul.f32 %v3307_v1, %v1733_v52 }
0x12a4   :  { %v3874_v53 = vpop.eup %3873 }
0x12a5   :  { %v1734_v54 = vmul.f32 %v3874_v53, %v1718_v34  ;;  %v4609_v59 = vadd.f32 %v3308_v55, %v1741_v56  ;;  %v3820_v34 = vld [vmem:[%s4829_s10 + $0x38] sm:$0xff]  }
0x12a7   :  { %v1742_v58 = vmul.f32 %v3307_v1, %v1734_v54 }
0x12a9   :  { %v4611_v57 = vadd.f32 %v3308_v55, %v1742_v58 }
0x12ab   :  { %v1751_v60 = vpack.c.bf16 %v4611_v57, %v4609_v59 }
0x12ad   :  { %3326 = vmatmul.mubr.msk.bf16.vlgmr.msra.gmra.mxu1 %vm401_vm7, %v1751_v60 }
0x12ae   :  { %3632 = vmatprep.mubr.msk.f32.mxu1 %vm4132_vm8, %v4131_v10 }
0x136d   :  { %v1851_v3 = vpop.f32.mrf.mxu1 }
0x136e   :  { %v1852_v4 = vadd.f32 %v1851_v3, %v1767_v62 }
0x136f   :  { %v1853_v6 = vpop.f32.mrf.mxu1 }
0x1370   :  { %v1854_v7 = vadd.f32 %v1853_v6, %v4623_v63  ;;  %2035 = vrot.lane.b32.xlu1 %v1852_v4, %s4134_s30  ;;  %1870 = vrot.lane.b32.xlu0 %v1852_v4, %s4125_s21 }
0x1371   :  { %v1855_v9 = vpop.f32.mrf.mxu1 }
0x1372   :  { %3636 = vmatpush3.msra.mxu0 %v1854_v7  ;;  %v4644_v25 = vadd.f32 %v1855_v9, %v1767_v62 }
0x1373   :  { %3645 = vmatprep.subr.mxu0 %v4131_v10  ;;  %v1857_v13 = vpop.f32.mrf.mxu1 }
0x1374   :  { %2033 = vrot.lane.b32.xlu0 %v1852_v4, %s4133_s26  ;;  %v1858_v46 = vadd.f32 %v1857_v13, %v4623_v63 }
0x13e2   :  { %v1871_v8 = vpop.permute.xlu0 %1870  ;;  %v2036_v5 = vpop.permute.xlu1 %2035 }
0x13e3   :  { %3631 = vmatpush3.xpose.msk.msra.mxu1 %vm315_vm1, %v1871_v8 }
0x13e4   :  { %3640 = vmatprep.subr.mxu1 %v4131_v10 }
0x13e6   :  { %3633 = vmatmul.mubr.msk.f32.vlgmr.msra.gmra.mxu1 %vm315_vm1, %v1852_v4  ;;  %v2034_v11 = vpop.permute.xlu0 %2033 }
0x13e7   :  { %3641 = vmatpush3.xpose.msk.msra.mxu1 %vm315_vm1, %v2036_v5  ;;  %3642 = vmatprep.mubr.msk.f32.mxu1 %vm4132_vm8, %v4131_v10 }
0x13e8   :  { %3650 = vmatprep.subr.bf16.mxu1 %v4131_v10 }
0x13ea   :  { %3643 = vmatmul.mubr.msk.f32.vlgmr.msra.gmra.mxu1 %vm315_vm1, %v2034_v11 }
0x13eb   :  { %3654 = vmatprep.mubr.msk.bf16.mxu1 %vm4132_vm8, %v4131_v10  ;;  %3651 = vmatpush3.bf16.msra.mxu1 %v3820_v34 }
0x13ec   :  { %3652 = vmatprep.subr.bf16.mxu1 %v4131_v10 }
0x13ef   :  { %3653 = vmatpush3.bf16.msra.mxu1 %v3822_v44 }
0x13f0   :  { %3666 = vmatprep.subr.mxu1 %v4131_v10 }
0x14a6   :  { %v1942_v14 = vpop.f32.mrf.mxu1 }
0x14a7   :  { %v1946_v15 = vmul.f32 0.17677669, %v1942_v14 }
0x14a8   :  { %v3634_v12 = vpop.f32.mrf.mxu1 }
0x14a9   :  { %v1947_v17 = vadd.f32 %v1946_v15, %v4413_v20 }
0x14aa   :  { %v2107_v18 = vpop.f32.mrf.mxu1 }
0x14ab   :  { %v2111_v21 = vmul.f32 0.17677669, %v2107_v18  ;;  %v1948_v22 = vsel %vm647_vm9, %v1947_v17, -inf }
0x14ac   :  { %1949 = vmax.xlane.f32.xlu0 %v1948_v22  ;;  %v3644_v23 = vpop.f32.mrf.mxu1 }
0x14ad   :  { %v2112_v2 = vadd.f32 %v2111_v21, %v4413_v20  ;;  %v3356_v23 = vld [vmem:[%s4830_s11 + $0x1] ss:$0 sm:$0xff] }
0x14af   :  { %v2113_v24 = vsel %vm647_vm9, %v2112_v2, -inf }
0x14b0   :  { %2114 = vmax.xlane.f32.xlu1 %v2113_v24 }
0x14c1   :  { %2313 = vrot.lane.b32.xlu1 %v4644_v25, %s4125_s21 }
0x14c5   :  { %2476 = vrot.lane.b32.xlu1 %v4644_v25, %s4133_s26 }
0x1535   :  { %v1950_v26 = vpop.xlane.xlu0 %1949 }
0x1536   :  { %v1951_v27 = vsub.f32 %v1947_v17, %v1950_v26 }
0x1538   :  { %v1952_v19 = vmul.f32 1.442695, %v1951_v27 }
0x1539   :  { %v2115_v28 = vpop.xlane.xlu1 %2114 }
0x153a   :  { %3875 = vpow2.f32 %v1952_v19  ;;  %v2116_v29 = vsub.f32 %v2112_v2, %v2115_v28 }
0x153c   :  { %v2117_v30 = vmul.f32 1.442695, %v2116_v29 }
0x153d   :  { %v2314_v51 = vpop.permute.xlu1 %2313 }
0x153e   :  { %3877 = vpow2.f32 %v2117_v30 }
0x1541   :  { %v2477_v1 = vpop.permute.xlu1 %2476 }
0x1547   :  { %v3876_v20 = vpop.eup %3875 }
0x1548   :  { %v1954_v31 = vsel %vm647_vm9, %v3876_v20, 0.0 }
0x1549   :  { %1955 = vadd.xlane.f32.xlu0 %v1954_v31 }
0x154b   :  { %v3878_v32 = vpop.eup %3877 }
0x154c   :  { %v2119_v33 = vsel %vm647_vm9, %v3878_v32, 0.0 }
0x154d   :  { %2120 = vadd.xlane.f32.xlu0 %v2119_v33 }
0x1563   :  { %2125 = vrot.lane.b32.xlu0 %v1854_v7, %s4133_s26 }
0x1567   :  { %2478 = vrot.lane.b32.xlu0 %v4644_v25, %s4134_s30 }
0x15d2   :  { %v1956_v35 = vpop.xlane.xlu0 %1955 }
0x15d3   :  { %3879 = vrcp.f32 %v1956_v35 }
0x15d6   :  { %v2121_v36 = vpop.xlane.xlu0 %2120 }
0x15d7   :  { %3881 = vrcp.f32 %v2121_v36 }
0x15da   :  { %v2126_v39 = vpop.permute.xlu0 %2125 }
0x15de   :  { %v2479_v52 = vpop.permute.xlu0 %2478 }
0x15e0   :  { %v3880_v37 = vpop.eup %3879 }
0x15e1   :  { %v1958_v38 = vmul.f32 %v3880_v37, %v3876_v20 }
0x15e3   :  { %3638 = vmatmul.mubr.msk.f32.vlgmr.msra.gmra.mxu0 %vm647_vm9, %v1958_v38 }
0x15e4   :  { %v3882_v40 = vpop.eup %3881  ;;  %3646 = vmatpush3.msra.mxu0 %v2126_v39  ;;  %3647 = vmatprep.mubr.msk.f32.mxu0 %vm4132_vm8, %v4131_v10 }
0x15e5   :  { %v2123_v42 = vmul.f32 %v3882_v40, %v3878_v32  ;;  %3658 = vmatprep.subr.bf16.mxu0 %v4131_v10 }
0x15e7   :  { %3648 = vmatmul.mubr.msk.f32.vlgmr.msra.gmra.mxu0 %vm647_vm9, %v2123_v42 }
0x15e8   :  { %3659 = vmatpush3.bf16.msra.mxu0 %v4665_v41  ;;  %3662 = vmatprep.mubr.msk.bf16.mxu0 %vm4132_vm8, %v4131_v10 }
0x15e9   :  { %3660 = vmatprep.subr.bf16.mxu0 %v4131_v10 }
0x15ec   :  { %3661 = vmatpush3.bf16.msra.mxu0 %v4673_v43 }
0x15ed   :  { %3671 = vmatprep.subr.mxu0 %v4131_v10 }
0x16a3   :  { %v2028_v0 = vpop.f32.mrf.mxu0 }
0x16a4   :  { %v2032_v45 = vpack.c.bf16 %v2028_v0, %v2028_v0 }
0x16a5   :  { %v3639_v47 = vpop.f32.mrf.mxu0 }
0x16a6   :  { %3663 = vmatmul.mubr.msk.bf16.vlgmr.msra.gmra.mxu0 %vm315_vm1, %v2032_v45 }
0x16a7   :  { %3672 = vmatpush3.msra.mxu0 %v1858_v46  ;;  %v2197_v48 = vpop.f32.mrf.mxu0  ;;  %3673 = vmatprep.mubr.msk.f32.mxu0 %vm4132_vm8, %v4131_v10 }
0x16a8   :  { %v2201_v49 = vpack.c.bf16 %v2197_v48, %v2197_v48  ;;  %3681 = vmatprep.subr.mxu0 %v4131_v10 }
0x16a9   :  { %v3649_v50 = vpop.f32.mrf.mxu0 }
0x16aa   :  { %3655 = vmatmul.mubr.msk.bf16.vlgmr.msra.gmra.mxu1 %vm315_vm1, %v2201_v49 }
0x16ab   :  { %3667 = vmatpush3.xpose.msk.msra.mxu1 %vm315_vm1, %v2314_v51  ;;  %3668 = vmatprep.mubr.msk.f32.mxu1 %vm4132_vm8, %v4131_v10 }
0x16ac   :  { %3676 = vmatprep.subr.mxu1 %v4131_v10 }
0x16b2   :  { %3669 = vmatmul.mubr.msk.f32.vlgmr.msra.gmra.mxu1 %vm315_vm1, %v4644_v25 }
0x16b3   :  { %3677 = vmatpush3.xpose.msk.msra.mxu1 %vm315_vm1, %v2479_v52  ;;  %3678 = vmatprep.mubr.msk.f32.mxu1 %vm4132_vm8, %v4131_v10 }
0x16b4   :  { %3686 = vmatprep.subr.bf16.mxu1 %v4131_v10 }
0x16b6   :  { %3679 = vmatmul.mubr.msk.f32.vlgmr.msra.gmra.mxu1 %vm315_vm1, %v2477_v1 }
0x16b7   :  { %3687 = vmatpush3.bf16.msra.mxu1 %v3820_v34  ;;  %3690 = vmatprep.mubr.msk.bf16.mxu1 %vm4132_vm8, %v4131_v10 }
0x16b8   :  { %3688 = vmatprep.subr.bf16.mxu1 %v4131_v10 }
0x16bb   :  { %3689 = vmatpush3.bf16.msra.mxu1 %v3822_v44 }
0x16bc   :  { %3702 = vmatprep.subr.bf16.mxu1 %v4131_v10 }
0x1766   :  { %v2306_v53 = vpop.f32.mrf.mxu0 }
0x1768   :  { %v3664_v54 = vpop.f32.mrf.mxu0 }
0x176a   :  { %v2251_v56 = vpop.f32.mrf.mxu1  ;;  %v2309_v55 = vpop.f32.mrf.mxu0 }
0x176b   :  { %v2307_v58 = vadd.f32 %v2306_v53, %v2251_v56 }
0x176c   :  { %v3656_v60 = vpop.f32.mrf.mxu1  ;;  %v3665_v61 = vpop.f32.mrf.mxu0 }
0x176d   :  { %v2739_v24 = vadd.f32 %v3356_v23, %v2307_v58  ;;  %v3823_v61 = vld [vmem:[#allocation7 + $0x38] sm:$0xff]  }
0x176e   :  { %v2254_v62 = vpop.f32.mrf.mxu1 }
0x176f   :  { %v2741_v27 = vadd.f32 %v2739_v24, %v4609_v59  ;;  %v3825_v62 = vld [vmem:[#allocation7 + $0x28] sm:$0xff]  }
0x1770   :  { %v3657_v63 = vpop.f32.mrf.mxu1  ;;  %v3828_v24 = vld [vmem:[%s4835_s16 + $0x70] sm:$0xff]  }
0x1771   :  { %v2747_v19 = vsel %vm401_vm7, %v2741_v27, 0.0  ;;  %v3826_v63 = vld [vmem:[#allocation7 + $0x20] sm:$0xff]  }
0x1772   :  { %v2385_v3 = vpop.f32.mrf.mxu1 }
0x1773   :  { %v2389_v4 = vmul.f32 0.17677669, %v2385_v3 }
0x1774   :  { %v3670_v6 = vpop.f32.mrf.mxu1 }
0x1775   :  { %v2390_v7 = vadd.f32 %v2389_v4, %v4480_v16 }
0x1776   :  { %v2550_v8 = vpop.f32.mrf.mxu1 }
0x1777   :  { %v2554_v5 = vmul.f32 0.17677669, %v2550_v8  ;;  %v2391_v11 = vsel %vm647_vm9, %v2390_v7, -inf }
0x1778   :  { %2392 = vmax.xlane.f32.xlu0 %v2391_v11  ;;  %v3680_v9 = vpop.f32.mrf.mxu1 }
0x1779   :  { %v2555_v13 = vadd.f32 %v2554_v5, %v4480_v16 }
0x177b   :  { %v2556_v14 = vsel %vm647_vm9, %v2555_v13, -inf }
0x177c   :  { %2557 = vmax.xlane.f32.xlu1 %v2556_v14 }
0x178d   :  { %2568 = vrot.lane.b32.xlu1 %v1858_v46, %s4133_s26  ;;  %s4135_s26 = smov [#allocation17]  }
0x178e   :  { %s3236_s8 = sshll.u32 %s4135_s26, 4  ;;  %s3237_s8 = int_to_ptr.vmem [resolvable:$true] %s3236_s8 }
0x178f   :  { %p4090_p4 = scmp.lt.s32.totalorder %s3237_s8, %s3237_s8 }
0x1801   :  { %v2393_v15 = vpop.xlane.xlu0 %2392 }
0x1802   :  { %v2394_v12 = vsub.f32 %v2390_v7, %v2393_v15 }
0x1804   :  { %v2395_v17 = vmul.f32 1.442695, %v2394_v12 }
0x1805   :  { %v2558_v18 = vpop.xlane.xlu1 %2557 }
0x1806   :  { %3883 = vpow2.f32 %v2395_v17  ;;  %v2559_v21 = vsub.f32 %v2555_v13, %v2558_v18  ;;  %v3359_v13 = vld [vmem:[%s4831_s12 + $0x1] ss:$0 sm:$0xff] }
0x1807   :  { %v3360_v17 = vld [vmem:[%s4832_s13 + $0x1] ss:$0 sm:$0xff] }
0x1808   :  { %v2560_v22 = vmul.f32 1.442695, %v2559_v21 }
0x1809   :  { %v2569_v31 = vpop.permute.xlu1 %2568 }
0x180a   :  { %3885 = vpow2.f32 %v2560_v22 }
0x1813   :  { %v3884_v2 = vpop.eup %3883 }
0x1814   :  { %v2397_v16 = vsel %vm647_vm9, %v3884_v2, 0.0 }
0x1815   :  { %2398 = vadd.xlane.f32.xlu0 %v2397_v16  ;;  %v3829_v16 = vld [vmem:[%s4835_s16 + $0x68] sm:$0xff]  }
0x1817   :  { %v3886_v25 = vpop.eup %3885 }
0x1818   :  { %v2562_v26 = vsel %vm647_vm9, %v3886_v25, 0.0 }
0x1819   :  { %2563 = vadd.xlane.f32.xlu0 %v2562_v26  ;;  %v3831_v26 = vld [vmem:[%s4835_s16 + $0x58] sm:$0xff]  }
0x181d   :  { %2748 = vadd.xlane.f32.xlu0 %v2747_v19  ;;  %v3833_v19 = vld [vmem:[%s4835_s16 + $0x48] sm:$0xff]  }
0x189e   :  { %v2399_v28 = vpop.xlane.xlu0 %2398 }
0x189f   :  { %3887 = vrcp.f32 %v2399_v28  ;;  %v3834_v28 = vld [vmem:[%s4835_s16 + $0x40] sm:$0xff]  }
0x18a2   :  { %v2564_v29 = vpop.xlane.xlu0 %2563 }
0x18a3   :  { %3889 = vrcp.f32 %v2564_v29  ;;  %v3362_v29 = vld [vmem:[%s4834_s15 + $0x1] ss:$0 sm:$0xff] }
0x18a6   :  { %v2749_v39 = vpop.xlane.xlu0 %2748 }
0x18a7   :  { %v2753_v42 = vmul.f32 0.015625, %v2749_v39 }
0x18a9   :  { %v2755_v47 = vsub.f32 %v2741_v27, %v2753_v42  ;;  %v3832_v27 = vld [vmem:[%s4835_s16 + $0x50] sm:$0xff]  }
0x18ab   :  { %v2757_v1 = vmul.f32 %v2755_v47, %v2755_v47 }
0x18ac   :  { %v3888_v30 = vpop.eup %3887 }
0x18ad   :  { %v2401_v20 = vmul.f32 %v3888_v30, %v3884_v2  ;;  %v2759_v53 = vsel %vm401_vm7, %v2757_v1, 0.0  ;;  %v3827_v2 = vld [vmem:[%s4835_s16 + $0x78] sm:$0xff]  }
0x18af   :  { %3674 = vmatmul.mubr.msk.f32.vlgmr.msra.gmra.mxu0 %vm647_vm9, %v2401_v20 }
0x18b0   :  { %v3890_v32 = vpop.eup %3889  ;;  %3682 = vmatpush3.msra.mxu0 %v2569_v31  ;;  %3683 = vmatprep.mubr.msk.f32.mxu0 %vm4132_vm8, %v4131_v10 }
0x18b1   :  { %v2566_v33 = vmul.f32 %v3890_v32, %v3886_v25  ;;  %3694 = vmatprep.subr.bf16.mxu0 %v4131_v10  ;;  %v3830_v25 = vld [vmem:[%s4835_s16 + $0x60] sm:$0xff]  }
0x18b3   :  { %3684 = vmatmul.mubr.msk.f32.vlgmr.msra.gmra.mxu0 %vm647_vm9, %v2566_v33 }
0x18b4   :  { %3695 = vmatpush3.bf16.msra.mxu0 %v4665_v41  ;;  %3698 = vmatprep.mubr.msk.bf16.mxu0 %vm4132_vm8, %v4131_v10 }
0x18b5   :  { %3696 = vmatprep.subr.bf16.mxu0 %v4131_v10 }
0x18b8   :  { %3697 = vmatpush3.bf16.msra.mxu0 %v4673_v43 }
0x18b9   :  { %3714 = vmatprep.subr.bf16.mxu0 %v4131_v10 }
0x196f   :  { %v2471_v59 = vpop.f32.mrf.mxu0 }
0x1970   :  { %v2475_v34 = vpack.c.bf16 %v2471_v59, %v2471_v59 }
0x1971   :  { %v3675_v35 = vpop.f32.mrf.mxu0 }
0x1972   :  { %3699 = vmatmul.mubr.msk.bf16.vlgmr.msra.gmra.mxu0 %vm315_vm1, %v2475_v34 }
0x1973   :  { %v2640_v36 = vpop.f32.mrf.mxu0  ;;  %3730 = vmatprep.mubr.msk.bf16.mxu0 %vm4132_vm8, %v4131_v10  ;;  %3715 = vmatpush3.bf16.msra.mxu0 %v3827_v2 }
0x1974   :  { %v2644_v37 = vpack.c.bf16 %v2640_v36, %v2640_v36  ;;  %3716 = vmatprep.subr.bf16.mxu0 %v4131_v10 }
0x1975   :  { %v3685_v38 = vpop.f32.mrf.mxu0 }
0x1976   :  { %3691 = vmatmul.mubr.msk.bf16.vlgmr.msra.gmra.mxu1 %vm315_vm1, %v2644_v37 }
0x1977   :  { %3710 = vmatprep.mubr.msk.bf16.mxu1 %vm4132_vm8, %v4131_v10  ;;  %3703 = vmatpush3.bf16.msra.mxu1 %v3823_v61 }
0x1978   :  { %3704 = vmatprep.subr.bf16.mxu1 %v4131_v10  ;;  %3717 = vmatpush3.bf16.msra.mxu0 %v3828_v24 }
0x1979   :  { %3718 = vmatprep.subr.bf16.mxu0 %v4131_v10 }
0x197c   :  { %3719 = vmatpush3.bf16.msra.mxu0 %v3829_v16 }
0x197d   :  { %3720 = vmatprep.subr.bf16.mxu0 %v4131_v10 }
0x1980   :  { %3721 = vmatpush3.bf16.msra.mxu0 %v3830_v25  ;;  %v3393_v25 = vld [vmem:[#allocation10 + $0x1] ss:$0 sm:$0xff] }
0x1981   :  { %3722 = vmatprep.subr.bf16.mxu0 %v4131_v10 }
0x1984   :  { %3723 = vmatpush3.bf16.msra.mxu0 %v3831_v26 }
0x1985   :  { %3724 = vmatprep.subr.bf16.mxu0 %v4131_v10 }
0x1988   :  { %3725 = vmatpush3.bf16.msra.mxu0 %v3832_v27  ;;  %v3394_v27 = vld [vmem:[#allocation11 + $0x1] ss:$0 sm:$0xff] }
0x1989   :  { %3726 = vmatprep.subr.bf16.mxu0 %v4131_v10 }
0x198c   :  { %3727 = vmatpush3.bf16.msra.mxu0 %v3833_v19 }
0x198d   :  { %3728 = vmatprep.subr.bf16.mxu0 %v4131_v10 }
0x1990   :  { %3729 = vmatpush3.bf16.msra.mxu0 %v3834_v28 }
0x1a32   :  { %v2725_v40 = vpop.f32.mrf.mxu0 }
0x1a34   :  { %v3700_v41 = vpop.f32.mrf.mxu0 }
0x1a36   :  { %v2682_v43 = vpop.f32.mrf.mxu1  ;;  %v2728_v44 = vpop.f32.mrf.mxu0 }
0x1a37   :  { %v2726_v0 = vadd.f32 %v2725_v40, %v2682_v43 }
0x1a38   :  { %v3692_v45 = vpop.f32.mrf.mxu1  ;;  %v3701_v46 = vpop.f32.mrf.mxu0 }
0x1a39   :  { %v2740_v48 = vadd.f32 %v3356_v23, %v2726_v0 }
0x1a3a   :  { %v2685_v49 = vpop.f32.mrf.mxu1 }
0x1a3b   :  { %v2742_v50 = vadd.f32 %v2740_v48, %v4611_v57  ;;  %v3824_v57 = vld [vmem:[#allocation7 + $0x30] sm:$0xff]  }
0x1a3c   :  { %v3693_v51 = vpop.f32.mrf.mxu1  ;;  %3705 = vmatpush3.bf16.msra.mxu1 %v3824_v57 }
0x1a3d   :  { %v2750_v52 = vsel %vm401_vm7, %v2742_v50, 0.0  ;;  %3706 = vmatprep.subr.bf16.mxu1 %v4131_v10 }
0x1a3e   :  { %2751 = vadd.xlane.f32.xlu0 %v2750_v52  ;;  %v3384_v52 = vld [vmem:[#allocation8 + $0x1] ss:$0 sm:$0xff] }
0x1a40   :  { %3707 = vmatpush3.bf16.msra.mxu1 %v3825_v62 }
0x1a41   :  { %3708 = vmatprep.subr.bf16.mxu1 %v4131_v10 }
0x1a42   :  { %2760 = vadd.xlane.f32.xlu0 %v2759_v53 }
0x1a44   :  { %3709 = vmatpush3.bf16.msra.mxu1 %v3826_v63 }
0x1a45   :  { %3734 = vmatprep.subr.bf16.mxu1 %v4131_v10 }
0x1ac7   :  { %v2752_v54 = vpop.xlane.xlu0 %2751 }
0x1ac8   :  { %v2754_v56 = vmul.f32 0.015625, %v2752_v54 }
0x1aca   :  { %v2756_v55 = vsub.f32 %v2742_v50, %v2754_v56 }
0x1acb   :  { %v2761_v3 = vpop.xlane.xlu0 %2760 }
0x1acc   :  { %v2758_v58 = vmul.f32 %v2756_v55, %v2756_v55  ;;  %v2765_v4 = vmul.f32 0.015625, %v2761_v3 }
0x1ace   :  { %v2762_v60 = vsel %vm401_vm7, %v2758_v58, 0.0  ;;  %v2767_v6 = vadd.f32 1e-12, %v2765_v4 }
0x1acf   :  { %2763 = vadd.xlane.f32.xlu0 %v2762_v60 }
0x1ad0   :  { %3891 = vrsqrt.f32 %v2767_v6 }
0x1add   :  { %v3892_v11 = vpop.eup %3891 }
0x1ade   :  { %v2771_v9 = vmul.f32 %v3892_v11, %v2755_v47 }
0x1ae0   :  { %v2779_v12 = vmul.f32 %v3359_v13, %v2771_v9 }
0x1ae2   :  { %v2787_v21 = vadd.f32 %v3360_v17, %v2779_v12  ;;  %v3837_v12 = vld [vmem:[#allocation13 + $0x8] sm:$0xff]  }
0x1b58   :  { %v2764_v7 = vpop.xlane.xlu0 %2763 }
0x1b59   :  { %v2766_v8 = vmul.f32 0.015625, %v2764_v7 }
0x1b5b   :  { %v2768_v5 = vadd.f32 1e-12, %v2766_v8 }
0x1b5d   :  { %3893 = vrsqrt.f32 %v2768_v5 }
0x1b6a   :  { %v3894_v14 = vpop.eup %3893 }
0x1b6b   :  { %v2772_v15 = vmul.f32 %v3894_v14, %v2756_v55  ;;  %v3835_v14 = vld [vmem:[#allocation13 + $0x18] sm:$0xff]  }
0x1b6d   :  { %v2780_v18 = vmul.f32 %v3359_v13, %v2772_v15  ;;  %v3836_v15 = vld [vmem:[#allocation13 + $0x10] sm:$0xff]  }
0x1b6f   :  { %v4748_v22 = vadd.f32 %v3360_v17, %v2780_v18  ;;  %v3838_v17 = vld [vmem:[#allocation13] sm:$0xff]  }
0x1b71   :  { %v2789_v23 = vpack.c.bf16 %v4748_v22, %v2787_v21 }
0x1b73   :  { %3711 = vmatmul.mubr.msk.bf16.vlgmr.msra.gmra.mxu1 %vm401_vm7, %v2789_v23 }
0x1b74   :  { %3742 = vmatprep.mubr.msk.bf16.mxu1 %vm4132_vm8, %v4131_v10  ;;  %3735 = vmatpush3.bf16.msra.mxu1 %v3835_v14 }
0x1b75   :  { %3736 = vmatprep.subr.bf16.mxu1 %v4131_v10 }
0x1b78   :  { %3737 = vmatpush3.bf16.msra.mxu1 %v3836_v15 }
0x1b79   :  { %3738 = vmatprep.subr.bf16.mxu1 %v4131_v10 }
0x1b7c   :  { %3739 = vmatpush3.bf16.msra.mxu1 %v3837_v12 }
0x1b7d   :  { %3740 = vmatprep.subr.bf16.mxu1 %v4131_v10 }
0x1b80   :  { %3741 = vmatpush3.bf16.msra.mxu1 %v3838_v17 }
0x1b81   :  { %3746 = vmatprep.subr.bf16.mxu1 %v4131_v10 }
0x1c33   :  { %v2868_v30 = vpop.f32.mrf.mxu1 }
0x1c34   :  { %v2869_v20 = vadd.f32 %v3362_v29, %v2868_v30 }
0x1c35   :  { %v3712_v31 = vpop.f32.mrf.mxu1 }
0x1c36   :  { %v2875_v32 = vmul.f32 %v2869_v20, %v2869_v20 }
0x1c37   :  { %v2871_v33 = vpop.f32.mrf.mxu1 }
0x1c38   :  { %v2877_v59 = vmul.f32 %v2875_v32, %v2869_v20  ;;  %v2872_v34 = vadd.f32 %v3362_v29, %v2871_v33 }
0x1c39   :  { %v3713_v35 = vpop.f32.mrf.mxu1 }
0x1c3a   :  { %v2879_v36 = vmul.f32 0.044715, %v2877_v59  ;;  %v2876_v37 = vmul.f32 %v2872_v34, %v2872_v34  ;;  %v3840_v35 = vld [vmem:[%s4841_s22 + $0x10] sm:$0xff]  }
0x1c3c   :  { %v2881_v38 = vadd.f32 %v2879_v36, %v2869_v20  ;;  %v2878_v39 = vmul.f32 %v2876_v37, %v2872_v34  ;;  %v3841_v36 = vld [vmem:[%s4841_s22 + $0x8] sm:$0xff]   ;;  %v3842_v37 = vld [vmem:[%s4841_s22] sm:$0xff]  }
0x1c3e   :  { %v2883_v40 = vmul.f32 0.7978846, %v2881_v38  ;;  %v2880_v41 = vmul.f32 0.044715, %v2878_v39  ;;  %v3395_v38 = vld [vmem:[#allocation14] ss:$0 sm:$0xff] }
0x1c40   :  { %3895 = vtanh.f32 %v2883_v40  ;;  %v2882_v42 = vadd.f32 %v2880_v41, %v2872_v34 }
0x1c42   :  { %v2884_v43 = vmul.f32 0.7978846, %v2882_v42 }
0x1c44   :  { %3897 = vtanh.f32 %v2884_v43 }
0x1c4d   :  { %v3896_v44 = vpop.eup %3895 }
0x1c4e   :  { %v2887_v0 = vadd.f32 1.0, %v3896_v44 }
0x1c50   :  { %v2889_v46 = vmul.f32 0.5, %v2887_v0 }
0x1c51   :  { %v3898_v45 = vpop.eup %3897 }
0x1c52   :  { %v2888_v47 = vadd.f32 1.0, %v3898_v45  ;;  %v2891_v49 = vmul.f32 %v2889_v46, %v2869_v20  ;;  %v3401_v45 = vld [vmem:[#allocation16] ss:$0 sm:$0xff] }
0x1c54   :  { %v2890_v48 = vmul.f32 0.5, %v2888_v47 }
0x1c56   :  { %v2892_v50 = vmul.f32 %v2890_v48, %v2872_v34  ;;  %v3839_v34 = vld [vmem:[%s4841_s22 + $0x18] sm:$0xff]   ;;  %s4085_s22 = scalar_lea.vmem %s3237_s8, 32 }
0x1c57   :  { %p4086_p3 = scmp.ne.s32.totalorder %s3237_s8, %s4085_s22  ;;  %p4091_p5 = scmp.lt.s32.totalorder %s4085_s22, %s4085_s22 }
0x1c58   :  { %v2893_v51 = vpack.c.bf16 %v2892_v50, %v2891_v49 }
0x1c59   :  { %p4092_p6 = por %p4091_p5, %p4090_p4 }
0x1c5a   :  { %3731 = vmatmul.mubr.bf16.vlgmr.msra.gmra.mxu0 %v2893_v51 }
0x1c5b   :  { %p4093_p7 = pnand %p4092_p6, %p4086_p3 }
0x1d1a   :  { %v3001_v1 = vpop.f32.mrf.mxu0 }
0x1d1b   :  { %v3002_v53 = vadd.f32 %v3384_v52, %v3001_v1 }
0x1d1c   :  { %v3732_v54 = vpop.f32.mrf.mxu0 }
0x1d1d   :  { %v3008_v56 = vadd.f32 %v3002_v53, %v2787_v21 }
0x1d1e   :  { %v3004_v55 = vpop.f32.mrf.mxu0 }
0x1d1f   :  { %v3005_v58 = vadd.f32 %v3384_v52, %v3004_v55  ;;  %v3014_v60 = vsel %vm401_vm7, %v3008_v56, 0.0 }
0x1d20   :  { %3015 = vadd.xlane.f32.xlu0 %v3014_v60  ;;  %v3733_v61 = vpop.f32.mrf.mxu0 }
0x1d21   :  { %v3009_v57 = vadd.f32 %v3005_v58, %v4748_v22 }
0x1d23   :  { %v3017_v62 = vsel %vm401_vm7, %v3009_v57, 0.0 }
0x1d24   :  { %3018 = vadd.xlane.f32.xlu1 %v3017_v62 }
0x1da9   :  { %v3016_v63 = vpop.xlane.xlu0 %3015 }
0x1daa   :  { %v3020_v3 = vmul.f32 0.015625, %v3016_v63 }
0x1dac   :  { %v3022_v7 = vsub.f32 %v3008_v56, %v3020_v3 }
0x1dad   :  { %v3019_v4 = vpop.xlane.xlu1 %3018 }
0x1dae   :  { %v3021_v6 = vmul.f32 0.015625, %v3019_v4  ;;  %v3024_v9 = vmul.f32 %v3022_v7, %v3022_v7 }
0x1db0   :  { %v3023_v8 = vsub.f32 %v3009_v57, %v3021_v6  ;;  %v3026_v13 = vsel %vm401_vm7, %v3024_v9, 0.0 }
0x1db2   :  { %v3025_v5 = vmul.f32 %v3023_v8, %v3023_v8 }
0x1db4   :  { %v3029_v11 = vsel %vm401_vm7, %v3025_v5, 0.0 }
0x1db5   :  { %3030 = vadd.xlane.f32.xlu0 %v3029_v11 }
0x1db9   :  { %3027 = vadd.xlane.f32.xlu0 %v3026_v13 }
0x1e3e   :  { %v3031_v18 = vpop.xlane.xlu0 %3030 }
0x1e3f   :  { %v3033_v21 = vmul.f32 0.015625, %v3031_v18 }
0x1e41   :  { %v3035_v22 = vadd.f32 1e-12, %v3033_v21 }
0x1e42   :  { %v3028_v23 = vpop.xlane.xlu0 %3027 }
0x1e43   :  { %3899 = vrsqrt.f32 %v3035_v22  ;;  %v3032_v2 = vmul.f32 0.015625, %v3028_v23 }
0x1e45   :  { %v3034_v24 = vadd.f32 1e-12, %v3032_v2 }
0x1e47   :  { %3901 = vrsqrt.f32 %v3034_v24 }
0x1e50   :  { %v3900_v16 = vpop.eup %3899 }
0x1e51   :  { %v3039_v26 = vmul.f32 %v3900_v16, %v3023_v8 }
0x1e53   :  { %v3047_v19 = vmul.f32 %v3393_v25, %v3039_v26 }
0x1e54   :  { %v3902_v28 = vpop.eup %3901 }
0x1e55   :  { %v3038_v29 = vmul.f32 %v3902_v28, %v3022_v7  ;;  %v3055_v30 = vadd.f32 %v3394_v27, %v3047_v19 }
0x1e57   :  { %v3046_v20 = vmul.f32 %v3393_v25, %v3038_v29  ;;  %v3057_v32 = vrot.slane %v3055_v30, 7 }
0x1e59   :  { %v3054_v31 = vadd.f32 %v3394_v27, %v3046_v20 }
0x1e5b   :  { %v3060_v33 = vsel %vm3059_vm10, %v3054_v31, %v3057_v32 }
0x1e5c   :  { %v3061_v59 = vpack.c.bf16 %v3060_v33, %v3060_v33 }
0x1e5e   :  { %3743 = vmatmul.mubr.msk.bf16.vlgmr.msra.gmra.mxu1 %vm401_vm7, %v3061_v59 }
0x1e5f   :  { %3754 = vmatprep.mubr.msk.bf16.mxu1 %vm4132_vm8, %v4131_v10  ;;  %3747 = vmatpush3.bf16.msra.mxu1 %v3839_v34 }
0x1e60   :  { %3748 = vmatprep.subr.bf16.mxu1 %v4131_v10 }
0x1e63   :  { %3749 = vmatpush3.bf16.msra.mxu1 %v3840_v35 }
0x1e64   :  { %3750 = vmatprep.subr.bf16.mxu1 %v4131_v10 }
0x1e67   :  { %3751 = vmatpush3.bf16.msra.mxu1 %v3841_v36 }
0x1e68   :  { %3752 = vmatprep.subr.bf16.mxu1 %v4131_v10 }
0x1e6b   :  { %3753 = vmatpush3.bf16.msra.mxu1 %v3842_v37 }
0x1f1e   :  { %v3138_v39 = vpop.f32.mrf.mxu1 }
0x1f1f   :  { %v3139_v40 = vadd.f32 %v3395_v38, %v3138_v39 }
0x1f20   :  { %v3744_v41 = vpop.f32.mrf.mxu1 }
0x1f21   :  { %3903 = vtanh.f32 %v3139_v40 }
0x1f22   :  { %v3141_v42 = vpop.f32.mrf.mxu1 }
0x1f24   :  { %v3745_v43 = vpop.f32.mrf.mxu1 }
0x1f2e   :  { %v3904_v44 = vpop.eup %3903 }
0x1f2f   :  { %v3145_v0 = vpack.c.bf16 %v3904_v44, %v3904_v44 }
0x1f31   :  { %3755 = vmatmul.mubr.msk.bf16.vlgmr.msra.gmra.mxu1 %vm401_vm7, %v3145_v0 }
0x1ff1   :  { %v3222_v10 = vpop.f32.mrf.mxu1 }
0x1ff2   :  { %v3223_v46 = vadd.f32 %v3401_v45, %v3222_v10 }
0x1ff3   :  { %v3756_v47 = vpop.f32.mrf.mxu1 }
0x1ff4   :  { %3229 = vst.msk [vmem:[#allocation17] sm:$0x3] %vm3228_vm11, %v3223_v46 }
0x1ff5   :  { %v3225_v48 = vpop.f32.mrf.mxu1 }
0x1ff6   :  { %4096 = shalt.err (!%p4093_p7)
}
0x1ff7   :  { %3239 = dma.vmem_to_hbm [thread:$0]  %s3237_s8, 32, %s4843_s24, [#allocation4]   ;;  %v3757_v49 = vpop.f32.mrf.mxu1 }
0x1ff8   :  { %4115 = dma.done.wait [#allocation4], 32  }
0x1ff9   :  { %4116 = vsyncadd [#allocation4], 4294967264 }
0x1ffa   :  { %3243 = vsyncpa [#allocation3], 1 }
0x1ffb   :  { %3244 = vsyncpa [#allocation6], 1 }
0x1ffc   :  { %3245 = vsyncpa [#allocation9], 1 }
0x1ffd   :  { %3246 = vsyncpa [#allocation12], 1 }
0x1ffe   :  { %3247 = vsyncpa [#allocation15], 1 }
0x1fff   :  { %3248 = vsyncpa [#allocation4], 1 }

</bundles_post_ra>
